<compile_context>
chip_gen: v7x
topology: tpu7x:2x2x1
jax: 0.10.0
libtpu: 0.0.40
codegen_flags: <defaults>
</compile_context>

<pallas_src>
import functools

import jax
import jax.numpy as jnp
from jax import lax
from jax.experimental import pallas as pl
from jax.experimental.pallas import tpu as pltpu


# ----------------------------------------------------------------------------
# In-kernel helpers (f32 math)
# ----------------------------------------------------------------------------
def _layer_norm(x, gamma, beta, eps=1e-5):
    mu = jnp.mean(x, axis=-1, keepdims=True)
    var = jnp.mean((x - mu) ** 2, axis=-1, keepdims=True)
    return (x - mu) * lax.rsqrt(var + eps) * gamma + beta


def _gelu(x):
    # tanh approximation of GELU (EUP-friendly).
    # TODO(synk): HF xlm-roberta uses exact erf-GELU; tanh approx differs <1e-3.
    c = 0.7978845608028654  # sqrt(2/pi)
    return 0.5 * x * (1.0 + jnp.tanh(c * (x + 0.044715 * x * x * x)))


# ----------------------------------------------------------------------------
# Fused encoder-stack + classification-head kernel.
# grid = (B/Bt, L): batch blocks "parallel", layer index "arbitrary".
# Hidden state persists across the layer axis in x_scr (VMEM scratch).
# ----------------------------------------------------------------------------
def bert_layers_head_kernel(
    x_ref, mask_ref,
    wqkv_ref, bqkv_ref, wo_ref, bo_ref,
    ln1_g_ref, ln1_b_ref,
    w1_ref, b1_ref, w2_ref, b2_ref,
    ln2_g_ref, ln2_b_ref,
    wp_ref, bp_ref, wf_ref, bf_ref,
    out_ref,
    x_scr, ctx_scr,
    *, num_heads, bt, ff_chunk,
):
    layer = pl.program_id(1)
    n_layers = pl.num_programs(1)

    _, S, H = x_ref.shape
    M = bt * S
    dh = H // num_heads
    # Head-group width: as many heads as fit in 128 lanes (2 at BERT-base).
    hpg = min(num_heads, max(1, 128 // dh))
    while num_heads % hpg:
        hpg -= 1
    gw = hpg * dh
    n_groups = num_heads // hpg
    n_ff_chunks = w1_ref.shape[2] // ff_chunk

    # Load the bf16 embedding block into the carried f32 activation scratch.
    @pl.when(layer == 0)
    def _():
        for b in range(bt):
            x_scr[b * S:(b + 1) * S, :] = x_ref[b].astype(jnp.float32)

    x = x_scr[...]                                  # (M, H) f32
    x_bf = x.astype(jnp.bfloat16)

    # ---- fused Q/K/V projection (1/sqrt(dh) already folded into wq/bq) ----
    qkv_bf = (jnp.dot(x_bf, wqkv_ref[0], preferred_element_type=jnp.float32)
              + bqkv_ref[0]).astype(jnp.bfloat16)   # single bf16 cast
    q_bf = qkv_bf[:, 0 * H:1 * H]
    k_bf = qkv_bf[:, 1 * H:2 * H]
    v_bf = qkv_bf[:, 2 * H:3 * H]

    # ---- self-attention: per (sequence, head-group) ----
    # Group slices/stores are 128-lane aligned at real scale (gw = 128):
    # one lane-dense (S, gw) store into ctx_scr per group (no vst.msk).
    # TODO(synk): a fori_loop over (b, group) would bound live ranges further.
    for b in range(bt):
        r0 = b * S
        neg_b = (mask_ref[b] - 1.0) * 1e9           # (1, S): 0 keep, -1e9 pad
        for g in range(n_groups):
            off = g * gw
            qg = q_bf[r0:r0 + S, off:off + gw]
            kg = k_bf[r0:r0 + S, off:off + gw]
            vg = v_bf[r0:r0 + S, off:off + gw]
            parts = []
            for h in range(hpg):
                hs = slice(h * dh, (h + 1) * dh)
                s = lax.dot_general(qg[:, hs], kg[:, hs],
                                    (((1,), (1,)), ((), ())),
                                    preferred_element_type=jnp.float32) + neg_b
                s = s - jnp.max(s, axis=-1, keepdims=True)
                p = jnp.exp(s)
                # Rows always see >=1 unmasked key (CLS), so the denom is > 0.
                p = p * pl.reciprocal(jnp.sum(p, axis=-1, keepdims=True),
                                      approx=True)
                parts.append(jnp.dot(p.astype(jnp.bfloat16), vg[:, hs],
                                     preferred_element_type=jnp.float32))
            ctx_scr[r0:r0 + S, off:off + gw] = jnp.concatenate(parts, axis=1)

    # Single full-width (K = H) output projection over the assembled contexts.
    attn = jnp.dot(ctx_scr[...].astype(jnp.bfloat16), wo_ref[0],
                   preferred_element_type=jnp.float32) + bo_ref[0]
    h1 = _layer_norm(x + attn, ln1_g_ref[0], ln1_b_ref[0])

    # ---- feed-forward, chunked over the intermediate dim (VMEM-bounded) ----
    h1_bf = h1.astype(jnp.bfloat16)
    ff_out = jnp.zeros((M, H), jnp.float32)
    for c in range(n_ff_chunks):
        sl = slice(c * ff_chunk, (c + 1) * ff_chunk)
        a = _gelu(jnp.dot(h1_bf, w1_ref[0, :, sl],
                          preferred_element_type=jnp.float32) + b1_ref[0, :, sl])
        ff_out = ff_out + jnp.dot(a.astype(jnp.bfloat16), w2_ref[0, sl, :],
                                  preferred_element_type=jnp.float32)
    y = _layer_norm(h1 + ff_out + b2_ref[0], ln2_g_ref[0], ln2_b_ref[0])

    x_scr[...] = y                                  # carry to next layer

    # ---- fused pooler + dropout(identity) + fc + sigmoid on the last layer ----
    @pl.when(layer == n_layers - 1)
    def _():
        cls = jnp.concatenate([y[b * S:b * S + 1, :] for b in range(bt)], axis=0)
        pooled = jnp.tanh(
            jnp.dot(cls.astype(jnp.bfloat16), wp_ref[...],
                    preferred_element_type=jnp.float32) + bp_ref[...])
        # dropout(p=0.1) is identity at inference time.
        # TODO(synk): training-time dropout (stateful PRNG Bernoulli) not applied.
        logits = jnp.dot(pooled.astype(jnp.bfloat16), wf_ref[...],
                         preferred_element_type=jnp.float32) + bf_ref[...]
        out_ref[...] = jax.nn.sigmoid(logits).reshape(bt, 1, -1)


def _vmem_limit_bytes():
    """~96 MB on 128-MiB-VMEM chips (v5e/v6e), ~48 MB on v7x (64 MiB)."""
    try:
        cap = pltpu.get_tpu_info().vmem_capacity_bytes
    except Exception:
        return 48 * 1024 * 1024
    return min(int(cap * 3 // 4), 96 * 1024 * 1024)


def bert_encoder_with_head(x_emb, mask3, layer_weights, head_weights, *,
                           num_heads, bt, ff_chunk):
    """x_emb: (B, S, H) bf16 embeddings, mask3: (B, 1, S) f32.

    layer_weights: 12 arrays stacked with a leading L axis (bf16 matrices).
    head_weights:  [wp (H,H) bf16, bp (1,H) f32, wf (H,Cp) bf16, bf (1,Cp) f32].
    Returns sigmoid probabilities, shape (B, 1, Cp) (caller slices [:, 0, :C]).
    """
    B, S, H = x_emb.shape
    n_layers = layer_weights[0].shape[0]
    Cp = head_weights[2].shape[1]
    assert B % bt == 0

    # Stacked layer weights are rank-3 (L, r, c): take block l along L.
    layer_specs = [pl.BlockSpec((1,) + w.shape[1:], lambda b, l: (l, 0, 0))
                   for w in layer_weights]
    # Head weights are rank-2 and constant across the grid (fetched once).
    head_specs = [pl.BlockSpec(w.shape, lambda b, l: (0, 0))
                  for w in head_weights]

    kernel = functools.partial(bert_layers_head_kernel, num_heads=num_heads,
                               bt=bt, ff_chunk=ff_chunk)
    return pl.pallas_call(
        kernel,
        out_shape=jax.ShapeDtypeStruct((B, 1, Cp), jnp.float32),
        grid=(B // bt, n_layers),
        in_specs=[
            pl.BlockSpec((bt, S, H), lambda b, l: (b, 0, 0)),   # bf16 embeddings
            pl.BlockSpec((bt, 1, S), lambda b, l: (b, 0, 0)),   # attention mask
        ] + layer_specs + head_specs,
        out_specs=pl.BlockSpec((bt, 1, Cp), lambda b, l: (b, 0, 0)),
        scratch_shapes=[
            pltpu.VMEM((bt * S, H), jnp.float32),   # hidden state across layers
            pltpu.VMEM((bt * S, H), jnp.float32),   # assembled attention contexts
        ],
        compiler_params=pltpu.CompilerParams(
            dimension_semantics=("parallel", "arbitrary"),
            vmem_limit_bytes=_vmem_limit_bytes(),
        ),
    )(x_emb, mask3, *layer_weights, *head_weights)


# ----------------------------------------------------------------------------
# Parameter init (deterministic, synthetic), weight stacking, full forward
# ----------------------------------------------------------------------------
def init_params(key, *, vocab, max_seq, hidden, inter, n_layers, class_num):
    def nxt():
        nonlocal key
        key, sub = jax.random.split(key)
        return sub

    def rnd(shape, scale=0.02):
        return (scale * jax.random.normal(nxt(), shape)).astype(jnp.float32)

    p = {
        "word_emb": rnd((vocab, hidden)),
        "pos_emb": rnd((max_seq, hidden)),
        "type_emb": rnd((1, hidden)),
        "emb_ln_g": jnp.ones((hidden,), jnp.float32),
        "emb_ln_b": jnp.zeros((hidden,), jnp.float32),
        "layers": [],
        "w_pool": rnd((hidden, hidden)),
        "b_pool": jnp.zeros((1, hidden), jnp.float32),
        "w_fc": rnd((hidden, class_num)),
        "b_fc": jnp.zeros((1, class_num), jnp.float32),
    }
    for _ in range(n_layers):
        p["layers"].append({
            "wq": rnd((hidden, hidden)), "bq": jnp.zeros((1, hidden), jnp.float32),
            "wk": rnd((hidden, hidden)), "bk": jnp.zeros((1, hidden), jnp.float32),
            "wv": rnd((hidden, hidden)), "bv": jnp.zeros((1, hidden), jnp.float32),
            "wo": rnd((hidden, hidden)), "bo": jnp.zeros((1, hidden), jnp.float32),
            "ln1_g": jnp.ones((1, hidden), jnp.float32),
            "ln1_b": jnp.zeros((1, hidden), jnp.float32),
            "w_ff1": rnd((hidden, inter)), "b_ff1": jnp.zeros((1, inter), jnp.float32),
            "w_ff2": rnd((inter, hidden)), "b_ff2": jnp.zeros((1, hidden), jnp.float32),
            "ln2_g": jnp.ones((1, hidden), jnp.float32),
            "ln2_b": jnp.zeros((1, hidden), jnp.float32),
        })
    return p


def _stack_layer_weights(layers, *, num_heads):
    """Stack per-layer params along L; fuse QKV (scale folded); matrices -> bf16."""
    H = layers[0]["wq"].shape[0]
    scale = 1.0 / ((H // num_heads) ** 0.5)
    wqkv = jnp.stack([jnp.concatenate([lp["wq"] * scale, lp["wk"], lp["wv"]],
                                      axis=1) for lp in layers]).astype(jnp.bfloat16)
    bqkv = jnp.stack([jnp.concatenate([lp["bq"] * scale, lp["bk"], lp["bv"]],
                                      axis=1) for lp in layers])

    def stk(name, to_bf16=False):
        a = jnp.stack([lp[name] for lp in layers], axis=0)
        return a.astype(jnp.bfloat16) if to_bf16 else a

    return [
        wqkv, bqkv,
        stk("wo", True), stk("bo"),
        stk("ln1_g"), stk("ln1_b"),
        stk("w_ff1", True), stk("b_ff1"),
        stk("w_ff2", True), stk("b_ff2"),
        stk("ln2_g"), stk("ln2_b"),
    ]


def bert_multilabel_cls_forward(params, input_ids, attention_mask, *, num_heads,
                                batch_block=2):
    B, S = input_ids.shape
    H = params["word_emb"].shape[1]
    C = params["w_fc"].shape[1]
    inter = params["layers"][0]["w_ff1"].shape[1]
    assert H % num_heads == 0

    # --- embeddings (glue: gather + LN in plain JAX), shipped as bf16 ---
    emb = (params["word_emb"][input_ids]
           + params["pos_emb"][jnp.arange(S)][None, :, :]
           + params["type_emb"][0][None, None, :])
    mu = jnp.mean(emb, axis=-1, keepdims=True)
    var = jnp.mean((emb - mu) ** 2, axis=-1, keepdims=True)
    x = ((emb - mu) * lax.rsqrt(var + 1e-5)
         * params["emb_ln_g"] + params["emb_ln_b"]).astype(jnp.bfloat16)

    mask3 = attention_mask.astype(jnp.float32).reshape(B, 1, S)

    # --- stacked per-layer weights + lane-padded head weights ---
    layer_weights = _stack_layer_weights(params["layers"], num_heads=num_heads)
    Cp = max(128, ((C + 127) // 128) * 128)
    wf_pad = jnp.zeros((H, Cp), jnp.float32).at[:, :C].set(params["w_fc"])
    bf_pad = jnp.zeros((1, Cp), jnp.float32).at[:, :C].set(params["b_fc"])
    head_weights = [
        params["w_pool"].astype(jnp.bfloat16),
        params["b_pool"],
        wf_pad.astype(jnp.bfloat16),
        bf_pad,
    ]

    # Batch blocking (amortizes weight streaming) and FFN chunking (VMEM).
    bt = max(d for d in range(1, min(B, batch_block) + 1) if B % d == 0)
    ff_chunk = 1024 if inter % 1024 == 0 else inter

    probs_pad = bert_encoder_with_head(x, mask3, layer_weights, head_weights,
                                       num_heads=num_heads, bt=bt,
                                       ff_chunk=ff_chunk)
    return probs_pad[:, 0, :C]


if __name__ == "__main__":
    B, S, H, HEADS, INTER, L, VOCAB, C = 2, 8, 32, 2, 64, 2, 50, 5

    key = jax.random.PRNGKey(0)
    k_param, k_ids = jax.random.split(key)
    params = init_params(k_param, vocab=VOCAB, max_seq=S, hidden=H,
                         inter=INTER, n_layers=L, class_num=C)

    input_ids = jax.random.randint(k_ids, (B, S), 0, VOCAB, dtype=jnp.int32)
    attention_mask = jnp.ones((B, S), dtype=jnp.int32).at[1, 6:].set(0)  # pad tail

    out = bert_multilabel_cls_forward(params, input_ids, attention_mask,
                                      num_heads=HEADS)
    out = jax.block_until_ready(out)

    assert out.shape == (B, C)
    assert bool(jnp.all((out >= 0.0) & (out <= 1.0)))
    print("KERNEL_OK")
</pallas_src>

<mosaic_0001>
module attributes {stable_mosaic.version = 11 : i64} {
  func.func @bert_layers_head_kernel(%arg0: i32, %arg1: i32, %arg2: memref<2x8x32xbf16, #tpu.memory_space<vmem>>, %arg3: memref<2x1x8xf32, #tpu.memory_space<vmem>>, %arg4: memref<1x32x96xbf16, #tpu.memory_space<vmem>>, %arg5: memref<1x1x96xf32, #tpu.memory_space<vmem>>, %arg6: memref<1x32x32xbf16, #tpu.memory_space<vmem>>, %arg7: memref<1x1x32xf32, #tpu.memory_space<vmem>>, %arg8: memref<1x1x32xf32, #tpu.memory_space<vmem>>, %arg9: memref<1x1x32xf32, #tpu.memory_space<vmem>>, %arg10: memref<1x32x64xbf16, #tpu.memory_space<vmem>>, %arg11: memref<1x1x64xf32, #tpu.memory_space<vmem>>, %arg12: memref<1x64x32xbf16, #tpu.memory_space<vmem>>, %arg13: memref<1x1x32xf32, #tpu.memory_space<vmem>>, %arg14: memref<1x1x32xf32, #tpu.memory_space<vmem>>, %arg15: memref<1x1x32xf32, #tpu.memory_space<vmem>>, %arg16: memref<32x32xbf16, #tpu.memory_space<vmem>>, %arg17: memref<1x32xf32, #tpu.memory_space<vmem>>, %arg18: memref<32x128xbf16, #tpu.memory_space<vmem>>, %arg19: memref<1x128xf32, #tpu.memory_space<vmem>>, %arg20: memref<2x1x128xf32, #tpu.memory_space<vmem>>, %arg21: memref<16x32xf32, #tpu.memory_space<vmem>>, %arg22: memref<16x32xf32, #tpu.memory_space<vmem>>) attributes {dimension_semantics = [#tpu.dimension_semantics<parallel>, #tpu.dimension_semantics<arbitrary>], iteration_bounds = array<i64: 1, 2>, scalar_prefetch = 0 : i64, scratch_operands = 2 : i64, tpu.core_type = #tpu.core_type<tc>, window_params = [{transform_indices = @transform_0, window_bounds = array<i64: 2, 8, 32>}, {transform_indices = @transform_1, window_bounds = array<i64: 2, 1, 8>}, {transform_indices = @transform_2, window_bounds = array<i64: 1, 32, 96>}, {transform_indices = @transform_3, window_bounds = array<i64: 1, 1, 96>}, {transform_indices = @transform_4, window_bounds = array<i64: 1, 32, 32>}, {transform_indices = @transform_5, window_bounds = array<i64: 1, 1, 32>}, {transform_indices = @transform_6, window_bounds = array<i64: 1, 1, 32>}, {transform_indices = @transform_7, window_bounds = array<i64: 1, 1, 32>}, {transform_indices = @transform_8, window_bounds = array<i64: 1, 32, 64>}, {transform_indices = @transform_9, window_bounds = array<i64: 1, 1, 64>}, {transform_indices = @transform_10, window_bounds = array<i64: 1, 64, 32>}, {transform_indices = @transform_11, window_bounds = array<i64: 1, 1, 32>}, {transform_indices = @transform_12, window_bounds = array<i64: 1, 1, 32>}, {transform_indices = @transform_13, window_bounds = array<i64: 1, 1, 32>}, {pipeline_mode = #tpu.pipeline_mode<synchronous>, transform_indices = @transform_14, window_bounds = array<i64: 32, 32>}, {pipeline_mode = #tpu.pipeline_mode<synchronous>, transform_indices = @transform_15, window_bounds = array<i64: 1, 32>}, {pipeline_mode = #tpu.pipeline_mode<synchronous>, transform_indices = @transform_16, window_bounds = array<i64: 32, 128>}, {pipeline_mode = #tpu.pipeline_mode<synchronous>, transform_indices = @transform_17, window_bounds = array<i64: 1, 128>}, {transform_indices = @transform_18, window_bounds = array<i64: 2, 1, 128>}]} {
    %c0_i32 = arith.constant 0 : i32
    %0 = arith.cmpi eq, %arg1, %c0_i32 : i32
    %1 = arith.extui %0 : i1 to i32
    %c0_i32_0 = arith.constant 0 : i32
    %2 = arith.cmpi ne, %1, %c0_i32_0 : i32
    scf.if %2 {
      %c0_89 = arith.constant 0 : index
      %c0_90 = arith.constant 0 : index
      %c0_91 = arith.constant 0 : index
      %208 = vector.load %arg2[%c0_89, %c0_90, %c0_91] : memref<2x8x32xbf16, #tpu.memory_space<vmem>>, vector<1x8x32xbf16>
      %209 = vector.shape_cast %208 : vector<1x8x32xbf16> to vector<8x32xbf16>
      %210 = arith.extf %209 : vector<8x32xbf16> to vector<8x32xf32>
      %c0_92 = arith.constant 0 : index
      %c0_93 = arith.constant 0 : index
      %211 = vector.load %arg21[%c0_92, %c0_93] : memref<16x32xf32, #tpu.memory_space<vmem>>, vector<8x32xf32>
      tpu.vector_store %arg21[%c0_92, %c0_93], %210 {strides = array<i32>} : memref<16x32xf32, #tpu.memory_space<vmem>>, vector<8x32xf32>,
      %c1_94 = arith.constant 1 : index
      %c0_95 = arith.constant 0 : index
      %c0_96 = arith.constant 0 : index
      %212 = vector.load %arg2[%c1_94, %c0_95, %c0_96] : memref<2x8x32xbf16, #tpu.memory_space<vmem>>, vector<1x8x32xbf16>
      %213 = vector.shape_cast %212 : vector<1x8x32xbf16> to vector<8x32xbf16>
      %214 = arith.extf %213 : vector<8x32xbf16> to vector<8x32xf32>
      %c8_97 = arith.constant 8 : index
      %c0_98 = arith.constant 0 : index
      %215 = vector.load %arg21[%c8_97, %c0_98] : memref<16x32xf32, #tpu.memory_space<vmem>>, vector<8x32xf32>
      tpu.vector_store %arg21[%c8_97, %c0_98], %214 {strides = array<i32>} : memref<16x32xf32, #tpu.memory_space<vmem>>, vector<8x32xf32>,
    } else {
    }
    %c0 = arith.constant 0 : index
    %c0_1 = arith.constant 0 : index
    %3 = vector.load %arg21[%c0, %c0_1] : memref<16x32xf32, #tpu.memory_space<vmem>>, vector<16x32xf32>
    %4 = arith.truncf %3 : vector<16x32xf32> to vector<16x32xbf16>
    %c0_2 = arith.constant 0 : index
    %c0_3 = arith.constant 0 : index
    %c0_4 = arith.constant 0 : index
    %5 = vector.load %arg4[%c0_2, %c0_3, %c0_4] : memref<1x32x96xbf16, #tpu.memory_space<vmem>>, vector<1x32x96xbf16>
    %6 = vector.shape_cast %5 : vector<1x32x96xbf16> to vector<32x96xbf16>
    %cst = arith.constant dense<0.000000e+00> : vector<16x96xf32>
    %7 = tpu.matmul %4, %6, %cst {dimension_numbers = #tpu.dot_dimension_numbers<[1], [0], [0], [1], [0, 0, 1, 1], [], []>} : vector<16x32xbf16>, vector<32x96xbf16>, vector<16x96xf32> -> vector<16x96xf32>
    %c0_5 = arith.constant 0 : index
    %c0_6 = arith.constant 0 : index
    %c0_7 = arith.constant 0 : index
    %8 = vector.load %arg5[%c0_5, %c0_6, %c0_7] : memref<1x1x96xf32, #tpu.memory_space<vmem>>, vector<1x1x96xf32>
    %9 = vector.shape_cast %8 : vector<1x1x96xf32> to vector<1x96xf32>
    %10 = vector.broadcast %9 : vector<1x96xf32> to vector<16x96xf32>
    %11 = arith.addf %7, %10 : vector<16x96xf32>
    %12 = arith.truncf %11 : vector<16x96xf32> to vector<16x96xbf16>
    %13 = vector.extract_strided_slice %12 {offsets = [0, 0], sizes = [16, 32], strides = [1, 1]} : vector<16x96xbf16> to vector<16x32xbf16>
    %14 = vector.extract_strided_slice %12 {offsets = [0, 32], sizes = [16, 32], strides = [1, 1]} : vector<16x96xbf16> to vector<16x32xbf16>
    %15 = vector.extract_strided_slice %12 {offsets = [0, 64], sizes = [16, 32], strides = [1, 1]} : vector<16x96xbf16> to vector<16x32xbf16>
    %c0_8 = arith.constant 0 : index
    %c0_9 = arith.constant 0 : index
    %c0_10 = arith.constant 0 : index
    %16 = vector.load %arg3[%c0_8, %c0_9, %c0_10] : memref<2x1x8xf32, #tpu.memory_space<vmem>>, vector<1x1x8xf32>
    %17 = vector.shape_cast %16 : vector<1x1x8xf32> to vector<1x8xf32>
    %cst_11 = arith.constant 1.000000e+00 : f32
    %18 = vector.broadcast %cst_11 : f32 to vector<1x8xf32>
    %19 = arith.subf %17, %18 : vector<1x8xf32>
    %cst_12 = arith.constant 1.000000e+09 : f32
    %20 = vector.broadcast %cst_12 : f32 to vector<1x8xf32>
    %21 = arith.mulf %19, %20 : vector<1x8xf32>
    %22 = vector.extract_strided_slice %13 {offsets = [0, 0], sizes = [8, 32], strides = [1, 1]} : vector<16x32xbf16> to vector<8x32xbf16>
    %23 = vector.extract_strided_slice %14 {offsets = [0, 0], sizes = [8, 32], strides = [1, 1]} : vector<16x32xbf16> to vector<8x32xbf16>
    %24 = vector.extract_strided_slice %15 {offsets = [0, 0], sizes = [8, 32], strides = [1, 1]} : vector<16x32xbf16> to vector<8x32xbf16>
    %25 = vector.extract_strided_slice %22 {offsets = [0, 0], sizes = [8, 16], strides = [1, 1]} : vector<8x32xbf16> to vector<8x16xbf16>
    %26 = vector.extract_strided_slice %23 {offsets = [0, 0], sizes = [8, 16], strides = [1, 1]} : vector<8x32xbf16> to vector<8x16xbf16>
    %cst_13 = arith.constant dense<0.000000e+00> : vector<8x8xf32>
    %27 = tpu.matmul %25, %26, %cst_13 {dimension_numbers = #tpu.dot_dimension_numbers<[1], [1], [0], [0], [0, 0, 1, 0], [], []>} : vector<8x16xbf16>, vector<8x16xbf16>, vector<8x8xf32> -> vector<8x8xf32>
    %28 = vector.broadcast %21 : vector<1x8xf32> to vector<8x8xf32>
    %29 = arith.addf %27, %28 : vector<8x8xf32>
    %cst_14 = arith.constant dense<0xFF800000> : vector<8xf32>
    %30 = vector.multi_reduction <maximumf>, %29, %cst_14 [1] : vector<8x8xf32> to vector<8xf32>
    %31 = vector.shape_cast %30 : vector<8xf32> to vector<8x1xf32>
    %32 = vector.broadcast %31 : vector<8x1xf32> to vector<8x8xf32>
    %33 = arith.subf %29, %32 : vector<8x8xf32>
    %34 = math.exp %33 : vector<8x8xf32>
    %cst_15 = arith.constant dense<0.000000e+00> : vector<8xf32>
    %35 = vector.multi_reduction <add>, %34, %cst_15 [1] : vector<8x8xf32> to vector<8xf32>
    %36 = vector.shape_cast %35 : vector<8xf32> to vector<8x1xf32>
    %37 = tpu.reciprocal %36 {approx = true} : vector<8x1xf32> -> vector<8x1xf32>
    %38 = vector.broadcast %37 : vector<8x1xf32> to vector<8x8xf32>
    %39 = arith.mulf %34, %38 : vector<8x8xf32>
    %40 = arith.truncf %39 : vector<8x8xf32> to vector<8x8xbf16>
    %41 = vector.extract_strided_slice %24 {offsets = [0, 0], sizes = [8, 16], strides = [1, 1]} : vector<8x32xbf16> to vector<8x16xbf16>
    %cst_16 = arith.constant dense<0.000000e+00> : vector<8x16xf32>
    %42 = tpu.matmul %40, %41, %cst_16 {dimension_numbers = #tpu.dot_dimension_numbers<[1], [0], [0], [1], [0, 0, 1, 1], [], []>} : vector<8x8xbf16>, vector<8x16xbf16>, vector<8x16xf32> -> vector<8x16xf32>
    %43 = vector.extract_strided_slice %22 {offsets = [0, 16], sizes = [8, 16], strides = [1, 1]} : vector<8x32xbf16> to vector<8x16xbf16>
    %44 = vector.extract_strided_slice %23 {offsets = [0, 16], sizes = [8, 16], strides = [1, 1]} : vector<8x32xbf16> to vector<8x16xbf16>
    %cst_17 = arith.constant dense<0.000000e+00> : vector<8x8xf32>
    %45 = tpu.matmul %43, %44, %cst_17 {dimension_numbers = #tpu.dot_dimension_numbers<[1], [1], [0], [0], [0, 0, 1, 0], [], []>} : vector<8x16xbf16>, vector<8x16xbf16>, vector<8x8xf32> -> vector<8x8xf32>
    %46 = vector.broadcast %21 : vector<1x8xf32> to vector<8x8xf32>
    %47 = arith.addf %45, %46 : vector<8x8xf32>
    %cst_18 = arith.constant dense<0xFF800000> : vector<8xf32>
    %48 = vector.multi_reduction <maximumf>, %47, %cst_18 [1] : vector<8x8xf32> to vector<8xf32>
    %49 = vector.shape_cast %48 : vector<8xf32> to vector<8x1xf32>
    %50 = vector.broadcast %49 : vector<8x1xf32> to vector<8x8xf32>
    %51 = arith.subf %47, %50 : vector<8x8xf32>
    %52 = math.exp %51 : vector<8x8xf32>
    %cst_19 = arith.constant dense<0.000000e+00> : vector<8xf32>
    %53 = vector.multi_reduction <add>, %52, %cst_19 [1] : vector<8x8xf32> to vector<8xf32>
    %54 = vector.shape_cast %53 : vector<8xf32> to vector<8x1xf32>
    %55 = tpu.reciprocal %54 {approx = true} : vector<8x1xf32> -> vector<8x1xf32>
    %56 = vector.broadcast %55 : vector<8x1xf32> to vector<8x8xf32>
    %57 = arith.mulf %52, %56 : vector<8x8xf32>
    %58 = arith.truncf %57 : vector<8x8xf32> to vector<8x8xbf16>
    %59 = vector.extract_strided_slice %24 {offsets = [0, 16], sizes = [8, 16], strides = [1, 1]} : vector<8x32xbf16> to vector<8x16xbf16>
    %cst_20 = arith.constant dense<0.000000e+00> : vector<8x16xf32>
    %60 = tpu.matmul %58, %59, %cst_20 {dimension_numbers = #tpu.dot_dimension_numbers<[1], [0], [0], [1], [0, 0, 1, 1], [], []>} : vector<8x8xbf16>, vector<8x16xbf16>, vector<8x16xf32> -> vector<8x16xf32>
    %61 = tpu.concatenate %42, %60 in 1 : vector<8x16xf32>, vector<8x16xf32> -> vector<8x32xf32>
    %c0_21 = arith.constant 0 : index
    %c0_22 = arith.constant 0 : index
    %62 = vector.load %arg22[%c0_21, %c0_22] : memref<16x32xf32, #tpu.memory_space<vmem>>, vector<8x32xf32>
    tpu.vector_store %arg22[%c0_21, %c0_22], %61 {strides = array<i32>} : memref<16x32xf32, #tpu.memory_space<vmem>>, vector<8x32xf32>,
    %c1 = arith.constant 1 : index
    %c0_23 = arith.constant 0 : index
    %c0_24 = arith.constant 0 : index
    %63 = vector.load %arg3[%c1, %c0_23, %c0_24] : memref<2x1x8xf32, #tpu.memory_space<vmem>>, vector<1x1x8xf32>
    %64 = vector.shape_cast %63 : vector<1x1x8xf32> to vector<1x8xf32>
    %cst_25 = arith.constant 1.000000e+00 : f32
    %65 = vector.broadcast %cst_25 : f32 to vector<1x8xf32>
    %66 = arith.subf %64, %65 : vector<1x8xf32>
    %cst_26 = arith.constant 1.000000e+09 : f32
    %67 = vector.broadcast %cst_26 : f32 to vector<1x8xf32>
    %68 = arith.mulf %66, %67 : vector<1x8xf32>
    %69 = vector.extract_strided_slice %13 {offsets = [8, 0], sizes = [8, 32], strides = [1, 1]} : vector<16x32xbf16> to vector<8x32xbf16>
    %70 = vector.extract_strided_slice %14 {offsets = [8, 0], sizes = [8, 32], strides = [1, 1]} : vector<16x32xbf16> to vector<8x32xbf16>
    %71 = vector.extract_strided_slice %15 {offsets = [8, 0], sizes = [8, 32], strides = [1, 1]} : vector<16x32xbf16> to vector<8x32xbf16>
    %72 = vector.extract_strided_slice %69 {offsets = [0, 0], sizes = [8, 16], strides = [1, 1]} : vector<8x32xbf16> to vector<8x16xbf16>
    %73 = vector.extract_strided_slice %70 {offsets = [0, 0], sizes = [8, 16], strides = [1, 1]} : vector<8x32xbf16> to vector<8x16xbf16>
    %cst_27 = arith.constant dense<0.000000e+00> : vector<8x8xf32>
    %74 = tpu.matmul %72, %73, %cst_27 {dimension_numbers = #tpu.dot_dimension_numbers<[1], [1], [0], [0], [0, 0, 1, 0], [], []>} : vector<8x16xbf16>, vector<8x16xbf16>, vector<8x8xf32> -> vector<8x8xf32>
    %75 = vector.broadcast %68 : vector<1x8xf32> to vector<8x8xf32>
    %76 = arith.addf %74, %75 : vector<8x8xf32>
    %cst_28 = arith.constant dense<0xFF800000> : vector<8xf32>
    %77 = vector.multi_reduction <maximumf>, %76, %cst_28 [1] : vector<8x8xf32> to vector<8xf32>
    %78 = vector.shape_cast %77 : vector<8xf32> to vector<8x1xf32>
    %79 = vector.broadcast %78 : vector<8x1xf32> to vector<8x8xf32>
    %80 = arith.subf %76, %79 : vector<8x8xf32>
    %81 = math.exp %80 : vector<8x8xf32>
    %cst_29 = arith.constant dense<0.000000e+00> : vector<8xf32>
    %82 = vector.multi_reduction <add>, %81, %cst_29 [1] : vector<8x8xf32> to vector<8xf32>
    %83 = vector.shape_cast %82 : vector<8xf32> to vector<8x1xf32>
    %84 = tpu.reciprocal %83 {approx = true} : vector<8x1xf32> -> vector<8x1xf32>
    %85 = vector.broadcast %84 : vector<8x1xf32> to vector<8x8xf32>
    %86 = arith.mulf %81, %85 : vector<8x8xf32>
    %87 = arith.truncf %86 : vector<8x8xf32> to vector<8x8xbf16>
    %88 = vector.extract_strided_slice %71 {offsets = [0, 0], sizes = [8, 16], strides = [1, 1]} : vector<8x32xbf16> to vector<8x16xbf16>
    %cst_30 = arith.constant dense<0.000000e+00> : vector<8x16xf32>
    %89 = tpu.matmul %87, %88, %cst_30 {dimension_numbers = #tpu.dot_dimension_numbers<[1], [0], [0], [1], [0, 0, 1, 1], [], []>} : vector<8x8xbf16>, vector<8x16xbf16>, vector<8x16xf32> -> vector<8x16xf32>
    %90 = vector.extract_strided_slice %69 {offsets = [0, 16], sizes = [8, 16], strides = [1, 1]} : vector<8x32xbf16> to vector<8x16xbf16>
    %91 = vector.extract_strided_slice %70 {offsets = [0, 16], sizes = [8, 16], strides = [1, 1]} : vector<8x32xbf16> to vector<8x16xbf16>
    %cst_31 = arith.constant dense<0.000000e+00> : vector<8x8xf32>
    %92 = tpu.matmul %90, %91, %cst_31 {dimension_numbers = #tpu.dot_dimension_numbers<[1], [1], [0], [0], [0, 0, 1, 0], [], []>} : vector<8x16xbf16>, vector<8x16xbf16>, vector<8x8xf32> -> vector<8x8xf32>
    %93 = vector.broadcast %68 : vector<1x8xf32> to vector<8x8xf32>
    %94 = arith.addf %92, %93 : vector<8x8xf32>
    %cst_32 = arith.constant dense<0xFF800000> : vector<8xf32>
    %95 = vector.multi_reduction <maximumf>, %94, %cst_32 [1] : vector<8x8xf32> to vector<8xf32>
    %96 = vector.shape_cast %95 : vector<8xf32> to vector<8x1xf32>
    %97 = vector.broadcast %96 : vector<8x1xf32> to vector<8x8xf32>
    %98 = arith.subf %94, %97 : vector<8x8xf32>
    %99 = math.exp %98 : vector<8x8xf32>
    %cst_33 = arith.constant dense<0.000000e+00> : vector<8xf32>
    %100 = vector.multi_reduction <add>, %99, %cst_33 [1] : vector<8x8xf32> to vector<8xf32>
    %101 = vector.shape_cast %100 : vector<8xf32> to vector<8x1xf32>
    %102 = tpu.reciprocal %101 {approx = true} : vector<8x1xf32> -> vector<8x1xf32>
    %103 = vector.broadcast %102 : vector<8x1xf32> to vector<8x8xf32>
    %104 = arith.mulf %99, %103 : vector<8x8xf32>
    %105 = arith.truncf %104 : vector<8x8xf32> to vector<8x8xbf16>
    %106 = vector.extract_strided_slice %71 {offsets = [0, 16], sizes = [8, 16], strides = [1, 1]} : vector<8x32xbf16> to vector<8x16xbf16>
    %cst_34 = arith.constant dense<0.000000e+00> : vector<8x16xf32>
    %107 = tpu.matmul %105, %106, %cst_34 {dimension_numbers = #tpu.dot_dimension_numbers<[1], [0], [0], [1], [0, 0, 1, 1], [], []>} : vector<8x8xbf16>, vector<8x16xbf16>, vector<8x16xf32> -> vector<8x16xf32>
    %108 = tpu.concatenate %89, %107 in 1 : vector<8x16xf32>, vector<8x16xf32> -> vector<8x32xf32>
    %c8 = arith.constant 8 : index
    %c0_35 = arith.constant 0 : index
    %109 = vector.load %arg22[%c8, %c0_35] : memref<16x32xf32, #tpu.memory_space<vmem>>, vector<8x32xf32>
    tpu.vector_store %arg22[%c8, %c0_35], %108 {strides = array<i32>} : memref<16x32xf32, #tpu.memory_space<vmem>>, vector<8x32xf32>,
    %c0_36 = arith.constant 0 : index
    %c0_37 = arith.constant 0 : index
    %110 = vector.load %arg22[%c0_36, %c0_37] : memref<16x32xf32, #tpu.memory_space<vmem>>, vector<16x32xf32>
    %111 = arith.truncf %110 : vector<16x32xf32> to vector<16x32xbf16>
    %c0_38 = arith.constant 0 : index
    %c0_39 = arith.constant 0 : index
    %c0_40 = arith.constant 0 : index
    %112 = vector.load %arg6[%c0_38, %c0_39, %c0_40] : memref<1x32x32xbf16, #tpu.memory_space<vmem>>, vector<1x32x32xbf16>
    %113 = vector.shape_cast %112 : vector<1x32x32xbf16> to vector<32x32xbf16>
    %cst_41 = arith.constant dense<0.000000e+00> : vector<16x32xf32>
    %114 = tpu.matmul %111, %113, %cst_41 {dimension_numbers = #tpu.dot_dimension_numbers<[1], [0], [0], [1], [0, 0, 1, 1], [], []>} : vector<16x32xbf16>, vector<32x32xbf16>, vector<16x32xf32> -> vector<16x32xf32>
    %c0_42 = arith.constant 0 : index
    %c0_43 = arith.constant 0 : index
    %c0_44 = arith.constant 0 : index
    %115 = vector.load %arg7[%c0_42, %c0_43, %c0_44] : memref<1x1x32xf32, #tpu.memory_space<vmem>>, vector<1x1x32xf32>
    %116 = vector.shape_cast %115 : vector<1x1x32xf32> to vector<1x32xf32>
    %117 = vector.broadcast %116 : vector<1x32xf32> to vector<16x32xf32>
    %118 = arith.addf %114, %117 : vector<16x32xf32>
    %119 = arith.addf %3, %118 : vector<16x32xf32>
    %c0_45 = arith.constant 0 : index
    %c0_46 = arith.constant 0 : index
    %c0_47 = arith.constant 0 : index
    %120 = vector.load %arg8[%c0_45, %c0_46, %c0_47] : memref<1x1x32xf32, #tpu.memory_space<vmem>>, vector<1x1x32xf32>
    %121 = vector.shape_cast %120 : vector<1x1x32xf32> to vector<1x32xf32>
    %c0_48 = arith.constant 0 : index
    %c0_49 = arith.constant 0 : index
    %c0_50 = arith.constant 0 : index
    %122 = vector.load %arg9[%c0_48, %c0_49, %c0_50] : memref<1x1x32xf32, #tpu.memory_space<vmem>>, vector<1x1x32xf32>
    %123 = vector.shape_cast %122 : vector<1x1x32xf32> to vector<1x32xf32>
    %cst_51 = arith.constant dense<0.000000e+00> : vector<16xf32>
    %124 = vector.multi_reduction <add>, %119, %cst_51 [1] : vector<16x32xf32> to vector<16xf32>
    %125 = vector.shape_cast %124 : vector<16xf32> to vector<16x1xf32>
    %cst_52 = arith.constant 3.200000e+01 : f32
    %126 = vector.broadcast %cst_52 : f32 to vector<16x1xf32>
    %127 = arith.divf %125, %126 : vector<16x1xf32>
    %128 = vector.broadcast %127 : vector<16x1xf32> to vector<16x32xf32>
    %129 = arith.subf %119, %128 : vector<16x32xf32>
    %130 = arith.mulf %129, %129 : vector<16x32xf32>
    %cst_53 = arith.constant dense<0.000000e+00> : vector<16xf32>
    %131 = vector.multi_reduction <add>, %130, %cst_53 [1] : vector<16x32xf32> to vector<16xf32>
    %132 = vector.shape_cast %131 : vector<16xf32> to vector<16x1xf32>
    %cst_54 = arith.constant 3.200000e+01 : f32
    %133 = vector.broadcast %cst_54 : f32 to vector<16x1xf32>
    %134 = arith.divf %132, %133 : vector<16x1xf32>
    %135 = vector.broadcast %127 : vector<16x1xf32> to vector<16x32xf32>
    %136 = arith.subf %119, %135 : vector<16x32xf32>
    %cst_55 = arith.constant 9.99999974E-6 : f32
    %137 = vector.broadcast %cst_55 : f32 to vector<16x1xf32>
    %138 = arith.addf %134, %137 : vector<16x1xf32>
    %139 = math.rsqrt %138 : vector<16x1xf32>
    %140 = vector.broadcast %139 : vector<16x1xf32> to vector<16x32xf32>
    %141 = arith.mulf %136, %140 : vector<16x32xf32>
    %142 = vector.broadcast %121 : vector<1x32xf32> to vector<16x32xf32>
    %143 = arith.mulf %141, %142 : vector<16x32xf32>
    %144 = vector.broadcast %123 : vector<1x32xf32> to vector<16x32xf32>
    %145 = arith.addf %143, %144 : vector<16x32xf32>
    %146 = arith.truncf %145 : vector<16x32xf32> to vector<16x32xbf16>
    %cst_56 = arith.constant 0.000000e+00 : f32
    %147 = vector.broadcast %cst_56 : f32 to vector<16x32xf32>
    %c0_57 = arith.constant 0 : index
    %c0_58 = arith.constant 0 : index
    %c0_59 = arith.constant 0 : index
    %148 = vector.load %arg10[%c0_57, %c0_58, %c0_59] : memref<1x32x64xbf16, #tpu.memory_space<vmem>>, vector<1x32x64xbf16>
    %149 = vector.shape_cast %148 : vector<1x32x64xbf16> to vector<32x64xbf16>
    %cst_60 = arith.constant dense<0.000000e+00> : vector<16x64xf32>
    %150 = tpu.matmul %146, %149, %cst_60 {dimension_numbers = #tpu.dot_dimension_numbers<[1], [0], [0], [1], [0, 0, 1, 1], [], []>} : vector<16x32xbf16>, vector<32x64xbf16>, vector<16x64xf32> -> vector<16x64xf32>
    %c0_61 = arith.constant 0 : index
    %c0_62 = arith.constant 0 : index
    %c0_63 = arith.constant 0 : index
    %151 = vector.load %arg11[%c0_61, %c0_62, %c0_63] : memref<1x1x64xf32, #tpu.memory_space<vmem>>, vector<1x1x64xf32>
    %152 = vector.shape_cast %151 : vector<1x1x64xf32> to vector<1x64xf32>
    %153 = vector.broadcast %152 : vector<1x64xf32> to vector<16x64xf32>
    %154 = arith.addf %150, %153 : vector<16x64xf32>
    %cst_64 = arith.constant 5.000000e-01 : f32
    %155 = vector.broadcast %cst_64 : f32 to vector<16x64xf32>
    %156 = arith.mulf %155, %154 : vector<16x64xf32>
    %cst_65 = arith.constant 4.471500e-02 : f32
    %157 = vector.broadcast %cst_65 : f32 to vector<16x64xf32>
    %158 = arith.mulf %157, %154 : vector<16x64xf32>
    %159 = arith.mulf %158, %154 : vector<16x64xf32>
    %160 = arith.mulf %159, %154 : vector<16x64xf32>
    %161 = arith.addf %154, %160 : vector<16x64xf32>
    %cst_66 = arith.constant 0.797884583 : f32
    %162 = vector.broadcast %cst_66 : f32 to vector<16x64xf32>
    %163 = arith.mulf %162, %161 : vector<16x64xf32>
    %164 = math.tanh %163 : vector<16x64xf32>
    %cst_67 = arith.constant 1.000000e+00 : f32
    %165 = vector.broadcast %cst_67 : f32 to vector<16x64xf32>
    %166 = arith.addf %165, %164 : vector<16x64xf32>
    %167 = arith.mulf %156, %166 : vector<16x64xf32>
    %168 = arith.truncf %167 : vector<16x64xf32> to vector<16x64xbf16>
    %c0_68 = arith.constant 0 : index
    %c0_69 = arith.constant 0 : index
    %c0_70 = arith.constant 0 : index
    %169 = vector.load %arg12[%c0_68, %c0_69, %c0_70] : memref<1x64x32xbf16, #tpu.memory_space<vmem>>, vector<1x64x32xbf16>
    %170 = vector.shape_cast %169 : vector<1x64x32xbf16> to vector<64x32xbf16>
    %cst_71 = arith.constant dense<0.000000e+00> : vector<16x32xf32>
    %171 = tpu.matmul %168, %170, %cst_71 {dimension_numbers = #tpu.dot_dimension_numbers<[1], [0], [0], [1], [0, 0, 1, 1], [], []>} : vector<16x64xbf16>, vector<64x32xbf16>, vector<16x32xf32> -> vector<16x32xf32>
    %172 = arith.addf %147, %171 : vector<16x32xf32>
    %173 = arith.addf %145, %172 : vector<16x32xf32>
    %c0_72 = arith.constant 0 : index
    %c0_73 = arith.constant 0 : index
    %c0_74 = arith.constant 0 : index
    %174 = vector.load %arg13[%c0_72, %c0_73, %c0_74] : memref<1x1x32xf32, #tpu.memory_space<vmem>>, vector<1x1x32xf32>
    %175 = vector.shape_cast %174 : vector<1x1x32xf32> to vector<1x32xf32>
    %176 = vector.broadcast %175 : vector<1x32xf32> to vector<16x32xf32>
    %177 = arith.addf %173, %176 : vector<16x32xf32>
    %c0_75 = arith.constant 0 : index
    %c0_76 = arith.constant 0 : index
    %c0_77 = arith.constant 0 : index
    %178 = vector.load %arg14[%c0_75, %c0_76, %c0_77] : memref<1x1x32xf32, #tpu.memory_space<vmem>>, vector<1x1x32xf32>
    %179 = vector.shape_cast %178 : vector<1x1x32xf32> to vector<1x32xf32>
    %c0_78 = arith.constant 0 : index
    %c0_79 = arith.constant 0 : index
    %c0_80 = arith.constant 0 : index
    %180 = vector.load %arg15[%c0_78, %c0_79, %c0_80] : memref<1x1x32xf32, #tpu.memory_space<vmem>>, vector<1x1x32xf32>
    %181 = vector.shape_cast %180 : vector<1x1x32xf32> to vector<1x32xf32>
    %cst_81 = arith.constant dense<0.000000e+00> : vector<16xf32>
    %182 = vector.multi_reduction <add>, %177, %cst_81 [1] : vector<16x32xf32> to vector<16xf32>
    %183 = vector.shape_cast %182 : vector<16xf32> to vector<16x1xf32>
    %cst_82 = arith.constant 3.200000e+01 : f32
    %184 = vector.broadcast %cst_82 : f32 to vector<16x1xf32>
    %185 = arith.divf %183, %184 : vector<16x1xf32>
    %186 = vector.broadcast %185 : vector<16x1xf32> to vector<16x32xf32>
    %187 = arith.subf %177, %186 : vector<16x32xf32>
    %188 = arith.mulf %187, %187 : vector<16x32xf32>
    %cst_83 = arith.constant dense<0.000000e+00> : vector<16xf32>
    %189 = vector.multi_reduction <add>, %188, %cst_83 [1] : vector<16x32xf32> to vector<16xf32>
    %190 = vector.shape_cast %189 : vector<16xf32> to vector<16x1xf32>
    %cst_84 = arith.constant 3.200000e+01 : f32
    %191 = vector.broadcast %cst_84 : f32 to vector<16x1xf32>
    %192 = arith.divf %190, %191 : vector<16x1xf32>
    %193 = vector.broadcast %185 : vector<16x1xf32> to vector<16x32xf32>
    %194 = arith.subf %177, %193 : vector<16x32xf32>
    %cst_85 = arith.constant 9.99999974E-6 : f32
    %195 = vector.broadcast %cst_85 : f32 to vector<16x1xf32>
    %196 = arith.addf %192, %195 : vector<16x1xf32>
    %197 = math.rsqrt %196 : vector<16x1xf32>
    %198 = vector.broadcast %197 : vector<16x1xf32> to vector<16x32xf32>
    %199 = arith.mulf %194, %198 : vector<16x32xf32>
    %200 = vector.broadcast %179 : vector<1x32xf32> to vector<16x32xf32>
    %201 = arith.mulf %199, %200 : vector<16x32xf32>
    %202 = vector.broadcast %181 : vector<1x32xf32> to vector<16x32xf32>
    %203 = arith.addf %201, %202 : vector<16x32xf32>
    %c0_86 = arith.constant 0 : index
    %c0_87 = arith.constant 0 : index
    %204 = vector.load %arg21[%c0_86, %c0_87] : memref<16x32xf32, #tpu.memory_space<vmem>>, vector<16x32xf32>
    tpu.vector_store %arg21[%c0_86, %c0_87], %203 {strides = array<i32>} : memref<16x32xf32, #tpu.memory_space<vmem>>, vector<16x32xf32>,
    %c1_i32 = arith.constant 1 : i32
    %205 = arith.cmpi eq, %arg1, %c1_i32 : i32
    %206 = arith.extui %205 : i1 to i32
    %c0_i32_88 = arith.constant 0 : i32
    %207 = arith.cmpi ne, %206, %c0_i32_88 : i32
    scf.if %207 {
      %208 = vector.extract_strided_slice %203 {offsets = [0, 0], sizes = [1, 32], strides = [1, 1]} : vector<16x32xf32> to vector<1x32xf32>
      %209 = vector.extract_strided_slice %203 {offsets = [8, 0], sizes = [1, 32], strides = [1, 1]} : vector<16x32xf32> to vector<1x32xf32>
      %210 = tpu.concatenate %208, %209 in 0 : vector<1x32xf32>, vector<1x32xf32> -> vector<2x32xf32>
      %211 = arith.truncf %210 : vector<2x32xf32> to vector<2x32xbf16>
      %c0_89 = arith.constant 0 : index
      %c0_90 = arith.constant 0 : index
      %212 = vector.load %arg16[%c0_89, %c0_90] : memref<32x32xbf16, #tpu.memory_space<vmem>>, vector<32x32xbf16>
      %cst_91 = arith.constant dense<0.000000e+00> : vector<2x32xf32>
      %213 = tpu.matmul %211, %212, %cst_91 {dimension_numbers = #tpu.dot_dimension_numbers<[1], [0], [0], [1], [0, 0, 1, 1], [], []>} : vector<2x32xbf16>, vector<32x32xbf16>, vector<2x32xf32> -> vector<2x32xf32>
      %c0_92 = arith.constant 0 : index
      %c0_93 = arith.constant 0 : index
      %214 = vector.load %arg17[%c0_92, %c0_93] : memref<1x32xf32, #tpu.memory_space<vmem>>, vector<1x32xf32>
      %215 = vector.broadcast %214 : vector<1x32xf32> to vector<2x32xf32>
      %216 = arith.addf %213, %215 : vector<2x32xf32>
      %217 = math.tanh %216 : vector<2x32xf32>
      %218 = arith.truncf %217 : vector<2x32xf32> to vector<2x32xbf16>
      %c0_94 = arith.constant 0 : index
      %c0_95 = arith.constant 0 : index
      %219 = vector.load %arg18[%c0_94, %c0_95] : memref<32x128xbf16, #tpu.memory_space<vmem>>, vector<32x128xbf16>
      %cst_96 = arith.constant dense<0.000000e+00> : vector<2x128xf32>
      %220 = tpu.matmul %218, %219, %cst_96 {dimension_numbers = #tpu.dot_dimension_numbers<[1], [0], [0], [1], [0, 0, 1, 1], [], []>} : vector<2x32xbf16>, vector<32x128xbf16>, vector<2x128xf32> -> vector<2x128xf32>
      %c0_97 = arith.constant 0 : index
      %c0_98 = arith.constant 0 : index
      %221 = vector.load %arg19[%c0_97, %c0_98] : memref<1x128xf32, #tpu.memory_space<vmem>>, vector<1x128xf32>
      %222 = vector.broadcast %221 : vector<1x128xf32> to vector<2x128xf32>
      %223 = arith.addf %220, %222 : vector<2x128xf32>
      %224 = arith.negf %223 : vector<2x128xf32>
      %225 = math.exp %224 : vector<2x128xf32>
      %cst_99 = arith.constant 1.000000e+00 : f32
      %226 = vector.broadcast %cst_99 : f32 to vector<2x128xf32>
      %227 = arith.addf %226, %225 : vector<2x128xf32>
      %228 = arith.divf %226, %227 : vector<2x128xf32>
      %229 = vector.shape_cast %228 : vector<2x128xf32> to vector<2x1x128xf32>
      %c0_100 = arith.constant 0 : index
      %c0_101 = arith.constant 0 : index
      %c0_102 = arith.constant 0 : index
      %230 = vector.load %arg20[%c0_100, %c0_101, %c0_102] : memref<2x1x128xf32, #tpu.memory_space<vmem>>, vector<2x1x128xf32>
      tpu.vector_store %arg20[%c0_100, %c0_101, %c0_102], %229 {strides = array<i32>} : memref<2x1x128xf32, #tpu.memory_space<vmem>>, vector<2x1x128xf32>,
    } else {
    }
    return
  }
  func.func @transform_0(%arg0: i32, %arg1: i32) -> (i32, i32, i32) {
    %c0_i32 = arith.constant 0 : i32
    %c0_i32_0 = arith.constant 0 : i32
    %c0_i32_1 = arith.constant 0 : i32
    return %arg0, %c0_i32, %c0_i32_0 : i32, i32, i32
  }
  func.func @transform_1(%arg0: i32, %arg1: i32) -> (i32, i32, i32) {
    %c0_i32 = arith.constant 0 : i32
    %c0_i32_0 = arith.constant 0 : i32
    %c0_i32_1 = arith.constant 0 : i32
    return %arg0, %c0_i32, %c0_i32_0 : i32, i32, i32
  }
  func.func @transform_2(%arg0: i32, %arg1: i32) -> (i32, i32, i32) {
    %c0_i32 = arith.constant 0 : i32
    %c0_i32_0 = arith.constant 0 : i32
    %c0_i32_1 = arith.constant 0 : i32
    return %arg1, %c0_i32, %c0_i32_0 : i32, i32, i32
  }
  func.func @transform_3(%arg0: i32, %arg1: i32) -> (i32, i32, i32) {
    %c0_i32 = arith.constant 0 : i32
    %c0_i32_0 = arith.constant 0 : i32
    %c0_i32_1 = arith.constant 0 : i32
    return %arg1, %c0_i32, %c0_i32_0 : i32, i32, i32
  }
  func.func @transform_4(%arg0: i32, %arg1: i32) -> (i32, i32, i32) {
    %c0_i32 = arith.constant 0 : i32
    %c0_i32_0 = arith.constant 0 : i32
    %c0_i32_1 = arith.constant 0 : i32
    return %arg1, %c0_i32, %c0_i32_0 : i32, i32, i32
  }
  func.func @transform_5(%arg0: i32, %arg1: i32) -> (i32, i32, i32) {
    %c0_i32 = arith.constant 0 : i32
    %c0_i32_0 = arith.constant 0 : i32
    %c0_i32_1 = arith.constant 0 : i32
    return %arg1, %c0_i32, %c0_i32_0 : i32, i32, i32
  }
  func.func @transform_6(%arg0: i32, %arg1: i32) -> (i32, i32, i32) {
    %c0_i32 = arith.constant 0 : i32
    %c0_i32_0 = arith.constant 0 : i32
    %c0_i32_1 = arith.constant 0 : i32
    return %arg1, %c0_i32, %c0_i32_0 : i32, i32, i32
  }
  func.func @transform_7(%arg0: i32, %arg1: i32) -> (i32, i32, i32) {
    %c0_i32 = arith.constant 0 : i32
    %c0_i32_0 = arith.constant 0 : i32
    %c0_i32_1 = arith.constant 0 : i32
    return %arg1, %c0_i32, %c0_i32_0 : i32, i32, i32
  }
  func.func @transform_8(%arg0: i32, %arg1: i32) -> (i32, i32, i32) {
    %c0_i32 = arith.constant 0 : i32
    %c0_i32_0 = arith.constant 0 : i32
    %c0_i32_1 = arith.constant 0 : i32
    return %arg1, %c0_i32, %c0_i32_0 : i32, i32, i32
  }
  func.func @transform_9(%arg0: i32, %arg1: i32) -> (i32, i32, i32) {
    %c0_i32 = arith.constant 0 : i32
    %c0_i32_0 = arith.constant 0 : i32
    %c0_i32_1 = arith.constant 0 : i32
    return %arg1, %c0_i32, %c0_i32_0 : i32, i32, i32
  }
  func.func @transform_10(%arg0: i32, %arg1: i32) -> (i32, i32, i32) {
    %c0_i32 = arith.constant 0 : i32
    %c0_i32_0 = arith.constant 0 : i32
    %c0_i32_1 = arith.constant 0 : i32
    return %arg1, %c0_i32, %c0_i32_0 : i32, i32, i32
  }
  func.func @transform_11(%arg0: i32, %arg1: i32) -> (i32, i32, i32) {
    %c0_i32 = arith.constant 0 : i32
    %c0_i32_0 = arith.constant 0 : i32
    %c0_i32_1 = arith.constant 0 : i32
    return %arg1, %c0_i32, %c0_i32_0 : i32, i32, i32
  }
  func.func @transform_12(%arg0: i32, %arg1: i32) -> (i32, i32, i32) {
    %c0_i32 = arith.constant 0 : i32
    %c0_i32_0 = arith.constant 0 : i32
    %c0_i32_1 = arith.constant 0 : i32
    return %arg1, %c0_i32, %c0_i32_0 : i32, i32, i32
  }
  func.func @transform_13(%arg0: i32, %arg1: i32) -> (i32, i32, i32) {
    %c0_i32 = arith.constant 0 : i32
    %c0_i32_0 = arith.constant 0 : i32
    %c0_i32_1 = arith.constant 0 : i32
    return %arg1, %c0_i32, %c0_i32_0 : i32, i32, i32
  }
  func.func @transform_14(%arg0: i32, %arg1: i32) -> (i32, i32) {
    %c0_i32 = arith.constant 0 : i32
    %c0_i32_0 = arith.constant 0 : i32
    %c0_i32_1 = arith.constant 0 : i32
    return %c0_i32, %c0_i32_0 : i32, i32
  }
  func.func @transform_15(%arg0: i32, %arg1: i32) -> (i32, i32) {
    %c0_i32 = arith.constant 0 : i32
    %c0_i32_0 = arith.constant 0 : i32
    %c0_i32_1 = arith.constant 0 : i32
    return %c0_i32, %c0_i32_0 : i32, i32
  }
  func.func @transform_16(%arg0: i32, %arg1: i32) -> (i32, i32) {
    %c0_i32 = arith.constant 0 : i32
    %c0_i32_0 = arith.constant 0 : i32
    %c0_i32_1 = arith.constant 0 : i32
    return %c0_i32, %c0_i32_0 : i32, i32
  }
  func.func @transform_17(%arg0: i32, %arg1: i32) -> (i32, i32) {
    %c0_i32 = arith.constant 0 : i32
    %c0_i32_0 = arith.constant 0 : i32
    %c0_i32_1 = arith.constant 0 : i32
    return %c0_i32, %c0_i32_0 : i32, i32
  }
  func.func @transform_18(%arg0: i32, %arg1: i32) -> (i32, i32, i32) {
    %c0_i32 = arith.constant 0 : i32
    %c0_i32_0 = arith.constant 0 : i32
    %c0_i32_1 = arith.constant 0 : i32
    return %arg0, %c0_i32, %c0_i32_0 : i32, i32, i32
  }
}

</mosaic_0001>

<bundles_post_ra>
// kernel: tpu_custom_call.1
= control target key start
LH: loop header
LB: loop body
LE: loop exit
PB: predicated region body
PF: predicated region fallthrough
CT: control target
= control target key end

     0   :  { %s3863_s0 = inlined_call_operand.hbm [shape: bf16[2,8,32], index: 0, kind: input, shape index: {}]   ;;  %s3864_s1 = inlined_call_operand.hbm [shape: f32[2,1,8], index: 1, kind: input, shape index: {}]   ;;  %s3865_s2 = inlined_call_operand.vmem [shape: bf16[2,32,96], index: 2, kind: input, shape index: {}]   ;;  %s3866_s3 = inlined_call_operand.hbm [shape: f32[2,1,96], index: 3, kind: input, shape index: {}]   ;;  %s3867_s4 = inlined_call_operand.vmem [shape: bf16[2,32,32], index: 4, kind: input, shape index: {}]   ;;  %s3868_s5 = inlined_call_operand.hbm [shape: f32[2,1,32], index: 5, kind: input, shape index: {}]   ;;  %s3869_s6 = inlined_call_operand.hbm [shape: f32[2,1,32], index: 6, kind: input, shape index: {}]   ;;  %s3870_s7 = inlined_call_operand.hbm [shape: f32[2,1,32], index: 7, kind: input, shape index: {}]   ;;  %s3871_s8 = inlined_call_operand.vmem [shape: bf16[2,32,64], index: 8, kind: input, shape index: {}]   ;;  %s3872_s9 = inlined_call_operand.hbm [shape: f32[2,1,64], index: 9, kind: input, shape index: {}]   ;;  %s3873_s10 = inlined_call_operand.vmem [shape: bf16[2,64,32], index: 10, kind: input, shape index: {}]   ;;  %s3874_s11 = inlined_call_operand.hbm [shape: f32[2,1,32], index: 11, kind: input, shape index: {}]   ;;  %s3875_s12 = inlined_call_operand.hbm [shape: f32[2,1,32], index: 12, kind: input, shape index: {}]   ;;  %s3876_s13 = inlined_call_operand.hbm [shape: f32[2,1,32], index: 13, kind: input, shape index: {}]   ;;  %s3877_s14 = inlined_call_operand.vmem [shape: bf16[32,32], index: 14, kind: input, shape index: {}]   ;;  %s3878_s15 = inlined_call_operand.vmem [shape: f32[1,32], index: 15, kind: input, shape index: {}]   ;;  %s3879_s16 = inlined_call_operand.hbm [shape: bf16[32,128], index: 16, kind: input, shape index: {}]   ;;  %s3880_s17 = inlined_call_operand.vmem [shape: f32[1,128], index: 17, kind: input, shape index: {}]   ;;  %s3881_s18 = inlined_call_operand.hbm [shape: f32[2,1,128], index: 18, kind: output, shape index: {}]  }
   0x1   :  { %3908 = sst [smem:[#allocation32_spill]] %s3863_s0 }
   0x2   :  { %3909 = sst [smem:[#allocation33_spill]] %s3864_s1 }
   0x3   :  { %3910 = sst [smem:[#allocation34_spill]] %s3865_s2 }
   0x4   :  { %3911 = sst [smem:[#allocation35_spill]] %s3866_s3 }
   0x5   :  { %3912 = sst [smem:[#allocation36_spill]] %s3867_s4 }
   0x6   :  { %3913 = sst [smem:[#allocation37_spill]] %s3871_s8 }
   0x7   :  { %3914 = sst [smem:[#allocation38_spill]] %s3873_s10 }
   0x8   :  { %3915 = sst [smem:[#allocation39_spill]] %s3877_s14 }
   0x9   :  { %3916 = sst [smem:[#allocation40_spill]] %s3878_s15 }
   0xa   :  { %3917 = sst [smem:[#allocation41_spill]] %s3880_s17 }
   0xb   :  { %3918 = sst [smem:[#allocation42_spill]] %s3881_s18 }
   0xc   :  { %23 = vsyncpa [#allocation5], 0 }
   0xd   :  { %24 = vsyncpa [#allocation8], 0 }
   0xe   :  { %25 = vsyncpa [#allocation6], 0  ;;  %s3243_s27 = smov 0   ;;  %s3245_s28 = smov 0  }
   0xf   :  { %s3247_s29 = smov 0   ;;  %s3249_s30 = smov 0  }
  0x10   :  { %s3251_s0 = smov 0   ;;  %s3253_s19 = smov 0  }
  0x11 LB: > { %3919 = sst [smem:[#allocation24_spill]] %s3102_s28  ;;  %s3272_s1 = sadd.s32 4294967295, %s3118_s19   ;;  %s3118_s19 = sphi %s3253_s19, %s31_s19   ;;  %s3114_s0 = sphi %s3251_s0, %s3986_s0   ;;  %s3110_s30 = sphi %s3249_s30, %s3985_s30   ;;  %s3106_s29 = sphi %s3247_s29, %s3984_s29   ;;  %s3102_s28 = sphi %s3245_s28, %s3983_s28   ;;  %s3098_s27 = sphi %s3243_s27, %s3982_s27  }
  0x12   : > { %3920 = sst [smem:[#allocation25_spill]] %s3106_s29  ;;  %s40_s20 = sadd.s32 1, %s3114_s0 }
  0x13   : > { %3921 = sst [smem:[#allocation26_spill]] %s3110_s30  ;;  %p41_p0 = scmp.ge.s32.totalorder %s40_s20, 2 }
  0x14   : > { %3922 = sst [smem:[#allocation27_spill]] %s3114_s0  ;;  %s128_s21 = sadd.s32 1, %s3106_s29 }
  0x15   : > { %3923 = sst [smem:[#allocation28_spill]] %s3118_s19  ;;  %p135_p1 = scmp.ne.s32.totalorder %s3106_s29, %s3102_s28 }
  0x16   : > { %p136_p2 = scmp.eq.s32.totalorder %s3118_s19, 0  ;;  %s3988_s20 = smov (%p41_p0, %s40_s20), 0 }
  0x17   : > { %3924 = sst [smem:[#allocation29_spill]] %s3988_s20  ;;  %p141_p4 = scmp.ne.s32.totalorder %s3102_s28, %s3098_s27 }
  0x18   : > { %p3281_p3 = por %p136_p2, %p135_p1  ;;  %s125_s2 = ssub.s32 %s3114_s0, %s3988_s20 }
  0x19   : > { %p3887_p5 = scmp.eq.s32.totalorder %s3272_s1, 0  ;;  %p126_p6 = scmp.eq.s32.totalorder %s125_s2, 0 }
  0x1a   : > { %s3925_s22 = scalar_select %p3281_p3, 1, 0 }
  0x1b   : > { %p2292_p7 = scmp.ge.s32.totalorder %s3118_s19, 1  ;;  %p3292_p8 = por %p3887_p5, %p141_p4 }
  0x1c   : > { %p522_p9 = scmp.lt.s32.totalorder %s3118_s19, 3  ;;  %s3120_s26 = smov [#allocation4]  }
  0x1d   : > { %s3926_s23 = scalar_select %p3292_p8, 1, 0 }
  0x1e   : > { %s3298_s24 = scalar_select %p126_p6, %s3106_s29, %s128_s21  }
  0x1f   : > { %3927 = sst [smem:[#allocation30_spill]] %s3926_s23  ;;  %p3300_p10 = pnand %p2292_p7, %p522_p9 }
  0x20   : > { %3928 = sst [smem:[#allocation31_spill]] %s3298_s24  ;;  %s537_s27 = sshll.u32 %s3120_s26, 4  ;;  %s538_s27 = int_to_ptr.vmem [resolvable:$true] %s537_s27 }
  0x21   : > { %s3929_s25 = scalar_select %p3300_p10, 1, 0 }
  0x22   : > { %p2542_p11 = pneg %p3300_p10  ;;  %s3931_s18 = sld [smem:[#allocation32_spill]] }
  0x24   : > { %p3308_p12 = pnand %p2542_p11, %p3887_p5 }
  0x26   : > { %s3930_s2 = scalar_select %p3308_p12, 1, 0 }
  0x27   : > { %p3322_p1 = pneg %p3308_p12 }
  0x28   : > { %s2702_s17 = scalar_lea.hbm %s3931_s18, 128 }
  0x29   : > { %p2703_p0 = scmp.ne.s32.totalorder %s3931_s18, %s2702_s17  ;;  %p2709_p6 = scmp.lt.u32.totalorder %s2702_s17, %s3931_s18 }
  0x2a   : > { %s3932_s26 = scalar_select %p3322_p1, 1, 0 }
  0x2b   : > { %p2705_p2 = pnand %p3322_p1, %p2703_p0 }
  0x2d   : > { %p2706_p4 = pneg %p2705_p2 }
  0x2f   : > { %p2711_p7 = pnand %p2709_p6, %p2706_p4 }
  0x31   : > { %2714 = shalt.err (!%p2711_p7)
}
  0x32   : > { %s2715_s24 = scalar_lea.vmem %s538_s27, 128  ;;  %p2723_p13 = scmp.lt.s32.totalorder %s538_s27, %s538_s27 }
  0x33   : > { %p2716_p9 = scmp.ne.s32.totalorder %s538_s27, %s2715_s24  ;;  %p2724_p8 = scmp.lt.s32.totalorder %s2715_s24, %s2715_s24 }
  0x35   : > { %p2718_p11 = pnand %p2716_p9, %p3322_p1  ;;  %p2725_p10 = por %p2724_p8, %p2723_p13 }
  0x37   : > { %p2719_p5 = pneg %p2718_p11 }
  0x39   : > { %p2726_p3 = pnand %p2725_p10, %p2719_p5 }
  0x3b   : > { %2729 = shalt.err (!%p2726_p3)
}
  0x3c   : > { %s3891_s14 = smov 64   ;;  %s3892_s8 = smov 4  }
  0x3d   : > { %2545 = dma.hbm_to_vmem [thread:$0]  (!%p3308_p12), %s3931_s18, 128, %s538_s27, [#allocation5], %s3891_s14, %s3891_s14, %s3892_s8  }
  0x3e   : > { %p3933_p0 = scmp.ne.s32.totalorder %s3925_s22, 0  ;;  %p3934_p8 = scmp.lt.s32.totalorder %s3118_s19, 2 }
  0x3f   : > { %s3350_s21 = sand.u32 1, %s3106_s29   ;;  %s3353_s24 = sshll.u32 %s3114_s0, 4 }
  0x40   : > { %p3345_p5 = pnand %p3934_p8, %p3933_p0  ;;  %s3936_s3 = sld [smem:[#allocation35_spill]] }
  0x41   : > { %s600_s22 = scalar_lea.vmem [#allocation9], %s3350_s21  ;;  %s3368_s14 = scalar_lea.hbm %s3868_s5, %s3353_s24 }
  0x42   : > { %s3935_s17 = scalar_select %p3345_p5, 1, 0 }
  0x43   : > { %s607_s27 = sshll.u32 %s600_s22, 4  ;;  %s3937_s8 = sand.u32 1, %s3118_s19   ;;  %s3362_s27 = int_to_ptr.vmem [resolvable:$true] %s607_s27 }
  0x44   : > { %s3372_s18 = scalar_lea.sflag [#allocation5], %s3937_s8  ;;  %p3378_p10 = pneg %p3345_p5 }
  0x46   : > { %s3359_s30 = scalar_lea.hbm %s3936_s3, %s3353_s24  ;;  %s2735_s10 = scalar_lea.hbm %s3936_s3, 32 }
  0x47   : > { %s2730_s4 = scalar_lea.hbm %s3359_s30, 16  ;;  %p2736_p4 = scmp.lt.u32.totalorder %s3359_s30, %s3936_s3 }
  0x48   : > { %p2731_p3 = scmp.ne.s32.totalorder %s3359_s30, %s2730_s4  ;;  %p2737_p6 = scmp.lt.u32.totalorder %s2735_s10, %s2730_s4 }
  0x49   : > { %p2739_p9 = scmp.lt.u32.totalorder %s2730_s4, %s3359_s30 }
  0x4a   : > { %p2733_p13 = pnand %p3378_p10, %p2731_p3  ;;  %p2738_p7 = por %p2737_p6, %p2736_p4 }
  0x4c   : > { %p2734_p2 = pneg %p2733_p13  ;;  %p2740_p11 = por %p2739_p9, %p2738_p7 }
  0x4e   : > { %p2741_p0 = pnand %p2740_p11, %p2734_p2 }
  0x50   : > { %2744 = shalt.err (!%p2741_p0)
}
  0x51   : > { %s2745_s8 = scalar_lea.vmem %s3362_s27, 16  ;;  %s3123_s0 = smov [#allocation9]  }
  0x52   : > { %p2746_p8 = scmp.ne.s32.totalorder %s3362_s27, %s2745_s8  ;;  %s2750_s22 = sshll.u32 %s3123_s0, 4  ;;  %s2751_s22 = int_to_ptr.vmem [resolvable:$false] %s2750_s22 }
  0x53   : > { %s2752_s29 = scalar_lea.vmem %s2751_s22, 32  ;;  %p2753_p12 = scmp.lt.s32.totalorder %s3362_s27, %s2751_s22 }
  0x54   : > { %p2748_p3 = pnand %p2746_p8, %p3378_p10  ;;  %p2754_p1 = scmp.lt.s32.totalorder %s2752_s29, %s2745_s8 }
  0x56   : > { %p2749_p13 = pneg %p2748_p3  ;;  %p2755_p4 = por %p2754_p1, %p2753_p12 }
  0x58   : > { %p2756_p6 = pnand %p2755_p4, %p2749_p13 }
  0x5a   : > { %2759 = shalt.err (!%p2756_p6)
}
  0x5b   : > { %2555 = dma.hbm_to_vmem [thread:$0]  (!%p3345_p5), %s3359_s30, 16, %s3362_s27, %s3372_s18  }
  0x5c   : > { %s625_s4 = scalar_lea.vmem [#allocation10], %s3350_s21  ;;  %s3407_s0 = scalar_lea.hbm %s3869_s6, %s3353_s24 }
  0x5d   : > { %s632_s10 = sshll.u32 %s625_s4, 4  ;;  %s2760_s22 = scalar_lea.hbm %s3368_s14, 16  ;;  %s633_s10 = int_to_ptr.vmem [resolvable:$true] %s632_s10 }
  0x5e   : > { %p2761_p12 = scmp.ne.s32.totalorder %s3368_s14, %s2760_s22  ;;  %s2765_s19 = scalar_lea.hbm %s3868_s5, 32 }
  0x5f   : > { %p2766_p7 = scmp.lt.u32.totalorder %s3368_s14, %s3868_s5  ;;  %p2767_p9 = scmp.lt.u32.totalorder %s2765_s19, %s2760_s22 }
  0x60   : > { %p2763_p1 = pnand %p2761_p12, %p3378_p10  ;;  %p2769_p0 = scmp.lt.u32.totalorder %s2760_s22, %s3368_s14 }
  0x61   : > { %p2768_p11 = por %p2767_p9, %p2766_p7 }
  0x62   : > { %p2764_p2 = pneg %p2763_p1 }
  0x63   : > { %p2770_p8 = por %p2769_p0, %p2768_p11 }
  0x65   : > { %p2771_p3 = pnand %p2770_p8, %p2764_p2 }
  0x67   : > { %2774 = shalt.err (!%p2771_p3)
}
  0x68   : > { %s2775_s30 = scalar_lea.vmem %s633_s10, 16  ;;  %s3124_s27 = smov [#allocation10]  }
  0x69   : > { %p2776_p13 = scmp.ne.s32.totalorder %s633_s10, %s2775_s30  ;;  %s2780_s4 = sshll.u32 %s3124_s27, 4  ;;  %s2781_s4 = int_to_ptr.vmem [resolvable:$false] %s2780_s4 }
  0x6a   : > { %s2782_s3 = scalar_lea.vmem %s2781_s4, 32  ;;  %p2783_p12 = scmp.lt.s32.totalorder %s633_s10, %s2781_s4 }
  0x6b   : > { %p2778_p4 = pnand %p2776_p13, %p3378_p10  ;;  %p2784_p1 = scmp.lt.s32.totalorder %s2782_s3, %s2775_s30 }
  0x6d   : > { %p2779_p6 = pneg %p2778_p4  ;;  %p2785_p5 = por %p2784_p1, %p2783_p12 }
  0x6f   : > { %p2786_p7 = pnand %p2785_p5, %p2779_p6 }
  0x71   : > { %2789 = shalt.err (!%p2786_p7)
}
  0x72   : > { %p3939_p9 = scmp.ne.s32.totalorder %s3935_s17, 0  ;;  %s642_s28 = scalar_lea.vmem [#allocation11], %s3350_s21 }
  0x73   : > { %s649_s19 = sshll.u32 %s642_s28, 4  ;;  %s3432_s8 = scalar_lea.hbm %s3870_s7, %s3353_s24  ;;  %s650_s19 = int_to_ptr.vmem [resolvable:$true] %s649_s19 }
  0x74   : > { %2558 = dma.hbm_to_vmem [thread:$0]  (!%p3939_p9), %s3368_s14, 16, %s633_s10, %s3372_s18  }
  0x75   : > { %s2790_s22 = scalar_lea.hbm %s3407_s0, 16  ;;  %s2795_s27 = scalar_lea.hbm %s3869_s6, 32 }
  0x76   : > { %p2791_p5 = scmp.ne.s32.totalorder %s3407_s0, %s2790_s22  ;;  %p2796_p0 = scmp.lt.u32.totalorder %s3407_s0, %s3869_s6 }
  0x77   : > { %p2797_p8 = scmp.lt.u32.totalorder %s2795_s27, %s2790_s22  ;;  %p2799_p13 = scmp.lt.u32.totalorder %s2790_s22, %s3407_s0 }
  0x78   : > { %p2793_p2 = pnand %p2791_p5, %p3378_p10 }
  0x79   : > { %p2798_p3 = por %p2797_p8, %p2796_p0 }
  0x7a   : > { %p2794_p11 = pneg %p2793_p2 }
  0x7b   : > { %p2800_p4 = por %p2799_p13, %p2798_p3 }
  0x7d   : > { %p2801_p6 = pnand %p2800_p4, %p2794_p11 }
  0x7f   : > { %2804 = shalt.err (!%p2801_p6)
}
  0x80   : > { %s2805_s14 = scalar_lea.vmem %s650_s19, 16  ;;  %s3125_s10 = smov [#allocation11]  }
  0x81   : > { %p2806_p12 = scmp.ne.s32.totalorder %s650_s19, %s2805_s14  ;;  %s2810_s28 = sshll.u32 %s3125_s10, 4  ;;  %s2811_s28 = int_to_ptr.vmem [resolvable:$false] %s2810_s28 }
  0x82   : > { %s2812_s23 = scalar_lea.vmem %s2811_s28, 32  ;;  %p2813_p5 = scmp.lt.s32.totalorder %s650_s19, %s2811_s28 }
  0x83   : > { %p2808_p1 = pnand %p2806_p12, %p3378_p10  ;;  %p2814_p2 = scmp.lt.s32.totalorder %s2812_s23, %s2805_s14 }
  0x85   : > { %p2809_p7 = pneg %p2808_p1  ;;  %p2815_p9 = por %p2814_p2, %p2813_p5 }
  0x87   : > { %p2816_p0 = pnand %p2815_p9, %p2809_p7 }
  0x89   : > { %2819 = shalt.err (!%p2816_p0)
}
  0x8a   : > { %p3940_p8 = scmp.ne.s32.totalorder %s3935_s17, 0  ;;  %s659_s15 = scalar_lea.vmem [#allocation12], %s3350_s21 }
  0x8b   : > { %s666_s22 = sshll.u32 %s659_s15, 4  ;;  %s3457_s27 = scalar_lea.hbm %s3872_s9, %s3353_s24  ;;  %s667_s22 = int_to_ptr.vmem [resolvable:$true] %s666_s22 }
  0x8c   : > { %2561 = dma.hbm_to_vmem [thread:$0]  (!%p3940_p8), %s3407_s0, 16, %s650_s19, %s3372_s18  }
  0x8d   : > { %s2820_s4 = scalar_lea.hbm %s3432_s8, 16  ;;  %s2825_s10 = scalar_lea.hbm %s3870_s7, 32 }
  0x8e   : > { %p2821_p9 = scmp.ne.s32.totalorder %s3432_s8, %s2820_s4  ;;  %p2826_p13 = scmp.lt.u32.totalorder %s3432_s8, %s3870_s7 }
  0x8f   : > { %p2827_p4 = scmp.lt.u32.totalorder %s2825_s10, %s2820_s4  ;;  %p2829_p12 = scmp.lt.u32.totalorder %s2820_s4, %s3432_s8 }
  0x90   : > { %p2823_p11 = pnand %p2821_p9, %p3378_p10 }
  0x91   : > { %p2828_p6 = por %p2827_p4, %p2826_p13 }
  0x92   : > { %p2824_p3 = pneg %p2823_p11 }
  0x93   : > { %p2830_p1 = por %p2829_p12, %p2828_p6 }
  0x95   : > { %p2831_p7 = pnand %p2830_p1, %p2824_p3 }
  0x97   : > { %2834 = shalt.err (!%p2831_p7)
}
  0x98   : > { %s2835_s0 = scalar_lea.vmem %s667_s22, 16  ;;  %s3126_s19 = smov [#allocation12]  }
  0x99   : > { %p2836_p5 = scmp.ne.s32.totalorder %s667_s22, %s2835_s0  ;;  %s2840_s15 = sshll.u32 %s3126_s19, 4  ;;  %s2841_s15 = int_to_ptr.vmem [resolvable:$false] %s2840_s15 }
  0x9a   : > { %s2842_s29 = scalar_lea.vmem %s2841_s15, 32  ;;  %p2843_p9 = scmp.lt.s32.totalorder %s667_s22, %s2841_s15 }
  0x9b   : > { %p2838_p2 = pnand %p2836_p5, %p3378_p10  ;;  %p2844_p11 = scmp.lt.s32.totalorder %s2842_s29, %s2835_s0 }
  0x9d   : > { %p2839_p0 = pneg %p2838_p2  ;;  %p2845_p8 = por %p2844_p11, %p2843_p9 }
  0x9f   : > { %p2846_p4 = pnand %p2845_p8, %p2839_p0 }
  0xa1   : > { %2849 = shalt.err (!%p2846_p4)
}
  0xa2   : > { %p3941_p13 = scmp.ne.s32.totalorder %s3935_s17, 0  ;;  %s684_s30 = scalar_lea.vmem [#allocation13], %s3350_s21 }
  0xa3   : > { %s691_s4 = sshll.u32 %s684_s30, 4  ;;  %s3482_s10 = scalar_lea.hbm %s3874_s11, %s3353_s24  ;;  %s692_s4 = int_to_ptr.vmem [resolvable:$true] %s691_s4 }
  0xa4   : > { %2564 = dma.hbm_to_vmem [thread:$0]  (!%p3941_p13), %s3432_s8, 16, %s667_s22, %s3372_s18  }
  0xa5   : > { %s2850_s28 = scalar_lea.hbm %s3457_s27, 16  ;;  %s2855_s19 = scalar_lea.hbm %s3872_s9, 32 }
  0xa6   : > { %p2851_p8 = scmp.ne.s32.totalorder %s3457_s27, %s2850_s28  ;;  %p2856_p12 = scmp.lt.u32.totalorder %s3457_s27, %s3872_s9 }
  0xa7   : > { %p2857_p1 = scmp.lt.u32.totalorder %s2855_s19, %s2850_s28  ;;  %p2859_p5 = scmp.lt.u32.totalorder %s2850_s28, %s3457_s27 }
  0xa8   : > { %p2853_p3 = pnand %p2851_p8, %p3378_p10 }
  0xa9   : > { %p2858_p7 = por %p2857_p1, %p2856_p12 }
  0xaa   : > { %p2854_p6 = pneg %p2853_p3 }
  0xab   : > { %p2860_p2 = por %p2859_p5, %p2858_p7 }
  0xad   : > { %p2861_p0 = pnand %p2860_p2, %p2854_p6 }
  0xaf   : > { %2864 = shalt.err (!%p2861_p0)
}
  0xb0   : > { %s2865_s8 = scalar_lea.vmem %s692_s4, 16  ;;  %s3127_s22 = smov [#allocation13]  }
  0xb1   : > { %p2866_p9 = scmp.ne.s32.totalorder %s692_s4, %s2865_s8  ;;  %s2870_s30 = sshll.u32 %s3127_s22, 4  ;;  %s2871_s30 = int_to_ptr.vmem [resolvable:$false] %s2870_s30 }
  0xb2   : > { %s2872_s3 = scalar_lea.vmem %s2871_s30, 32  ;;  %p2873_p8 = scmp.lt.s32.totalorder %s692_s4, %s2871_s30 }
  0xb3   : > { %p2868_p11 = pnand %p2866_p9, %p3378_p10  ;;  %p2874_p3 = scmp.lt.s32.totalorder %s2872_s3, %s2865_s8 }
  0xb5   : > { %p2869_p4 = pneg %p2868_p11  ;;  %p2875_p13 = por %p2874_p3, %p2873_p8 }
  0xb7   : > { %p2876_p1 = pnand %p2875_p13, %p2869_p4 }
  0xb9   : > { %2879 = shalt.err (!%p2876_p1)
}
  0xba   : > { %p3942_p12 = scmp.ne.s32.totalorder %s3935_s17, 0  ;;  %s709_s14 = scalar_lea.vmem [#allocation14], %s3350_s21 }
  0xbb   : > { %s716_s28 = sshll.u32 %s709_s14, 4  ;;  %s3128_s23 = smov [#allocation7]   ;;  %s3503_s28 = int_to_ptr.vmem [resolvable:$true] %s716_s28 }
  0xbc   : > { %2567 = dma.hbm_to_vmem [thread:$0]  (!%p3942_p12), %s3457_s27, 16, %s692_s4, %s3372_s18  }
  0xbd   : > { %s553_s0 = sshll.u32 %s3128_s23, 4  ;;  %s2880_s19 = scalar_lea.hbm %s3482_s10, 16  ;;  %s554_s0 = int_to_ptr.vmem [resolvable:$true] %s553_s0 }
  0xbe   : > { %p2881_p13 = scmp.ne.s32.totalorder %s3482_s10, %s2880_s19  ;;  %s2885_s8 = scalar_lea.hbm %s3874_s11, 32 }
  0xbf   : > { %p2886_p5 = scmp.lt.u32.totalorder %s3482_s10, %s3874_s11  ;;  %p2887_p2 = scmp.lt.u32.totalorder %s2885_s8, %s2880_s19 }
  0xc0   : > { %p2883_p6 = pnand %p2881_p13, %p3378_p10  ;;  %p2889_p9 = scmp.lt.u32.totalorder %s2880_s19, %s3482_s10 }
  0xc1   : > { %p2888_p0 = por %p2887_p2, %p2886_p5 }
  0xc2   : > { %p2884_p7 = pneg %p2883_p6 }
  0xc3   : > { %p2890_p11 = por %p2889_p9, %p2888_p0 }
  0xc5   : > { %p2891_p4 = pnand %p2890_p11, %p2884_p7 }
  0xc7   : > { %2894 = shalt.err (!%p2891_p4)
}
  0xc8   : > { %s2895_s27 = scalar_lea.vmem %s3503_s28, 16  ;;  %s3129_s4 = smov [#allocation14]  }
  0xc9   : > { %p2896_p8 = scmp.ne.s32.totalorder %s3503_s28, %s2895_s27  ;;  %s2900_s3 = sshll.u32 %s3129_s4, 4  ;;  %s2901_s3 = int_to_ptr.vmem [resolvable:$false] %s2900_s3 }
  0xca   : > { %s2902_s14 = scalar_lea.vmem %s2901_s3, 32  ;;  %p2903_p13 = scmp.lt.s32.totalorder %s3503_s28, %s2901_s3 }
  0xcb   : > { %p2898_p3 = pnand %p2896_p8, %p3378_p10  ;;  %p2904_p6 = scmp.lt.s32.totalorder %s2902_s14, %s2895_s27 }
  0xcd   : > { %p2899_p1 = pneg %p2898_p3  ;;  %p2905_p5 = por %p2904_p6, %p2903_p13 }
  0xcf   : > { %p2906_p2 = pnand %p2905_p5, %p2899_p1 }
  0xd1   : > { %2909 = shalt.err (!%p2906_p2)
}
  0xd2   : > { %2570 = dma.hbm_to_vmem [thread:$0]  (!%p3942_p12), %s3482_s10, 16, %s3503_s28, %s3372_s18  }
  0xd3   : > { %s3943_s15 = sld [smem:[#allocation33_spill]]  ;;  %p3944_p0 = scmp.ne.s32.totalorder %s3932_s26, 0 }
  0xd9   : > { %s2910_s29 = scalar_lea.hbm %s3943_s15, 32 }
  0xda   : > { %p2911_p7 = scmp.ne.s32.totalorder %s3943_s15, %s2910_s29  ;;  %p2917_p4 = scmp.lt.u32.totalorder %s2910_s29, %s3943_s15 }
  0xdc   : > { %p2913_p9 = pnand %p2911_p7, %p3944_p0 }
  0xde   : > { %p2914_p11 = pneg %p2913_p9 }
  0xe0   : > { %p2919_p8 = pnand %p2917_p4, %p2914_p11 }
  0xe2   : > { %2922 = shalt.err (!%p2919_p8)
}
  0xe3   : > { %s2923_s4 = scalar_lea.vmem %s554_s0, 32  ;;  %p2931_p6 = scmp.lt.s32.totalorder %s554_s0, %s554_s0 }
  0xe4   : > { %p2924_p3 = scmp.ne.s32.totalorder %s554_s0, %s2923_s4  ;;  %p2932_p5 = scmp.lt.s32.totalorder %s2923_s4, %s2923_s4 }
  0xe6   : > { %p2926_p1 = pnand %p2924_p3, %p3944_p0  ;;  %p2933_p2 = por %p2932_p5, %p2931_p6 }
  0xe8   : > { %p2927_p13 = pneg %p2926_p1 }
  0xea   : > { %p2934_p12 = pnand %p2933_p2, %p2927_p13 }
  0xec   : > { %2937 = shalt.err (!%p2934_p12)
}
  0xed   : > { %s3130_s10 = smov 16   ;;  %s3131_s28 = smov 1  }
  0xee   : > { %p3945_p7 = scmp.ne.s32.totalorder %s3930_s2, 0  ;;  %s3549_s29 = scalar_lea.hbm %s3875_s12, %s3353_s24 }
  0xef   : > { %s726_s8 = scalar_lea.vmem [#allocation15], %s3350_s21  ;;  %s2938_s30 = scalar_lea.hbm %s3549_s29, 16 }
  0xf0   : > { %2548 = dma.hbm_to_vmem [thread:$0]  (!%p3945_p7), %s3943_s15, 32, %s554_s0, [#allocation8], %s3130_s10, %s3130_s10, %s3131_s28  }
  0xf1   : > { %s733_s22 = sshll.u32 %s726_s8, 4  ;;  %p2939_p12 = scmp.ne.s32.totalorder %s3549_s29, %s2938_s30  ;;  %s734_s22 = int_to_ptr.vmem [resolvable:$true] %s733_s22 }
  0xf2   : > { %s2943_s0 = scalar_lea.hbm %s3875_s12, 32  ;;  %p2944_p4 = scmp.lt.u32.totalorder %s3549_s29, %s3875_s12 }
  0xf3   : > { %p2941_p9 = pnand %p2939_p12, %p3378_p10  ;;  %p2945_p8 = scmp.lt.u32.totalorder %s2943_s0, %s2938_s30 }
  0xf4   : > { %p2947_p1 = scmp.lt.u32.totalorder %s2938_s30, %s3549_s29 }
  0xf5   : > { %p2942_p11 = pneg %p2941_p9  ;;  %p2946_p3 = por %p2945_p8, %p2944_p4 }
  0xf7   : > { %p2948_p13 = por %p2947_p1, %p2946_p3 }
  0xf9   : > { %p2949_p6 = pnand %p2948_p13, %p2942_p11 }
  0xfb   : > { %2952 = shalt.err (!%p2949_p6)
}
  0xfc   : > { %s2953_s3 = scalar_lea.vmem %s734_s22, 16  ;;  %s3132_s14 = smov [#allocation15]  }
  0xfd   : > { %p2954_p5 = scmp.ne.s32.totalorder %s734_s22, %s2953_s3  ;;  %s2958_s23 = sshll.u32 %s3132_s14, 4  ;;  %s2959_s23 = int_to_ptr.vmem [resolvable:$false] %s2958_s23 }
  0xfe   : > { %s2960_s19 = scalar_lea.vmem %s2959_s23, 32  ;;  %p2961_p9 = scmp.lt.s32.totalorder %s734_s22, %s2959_s23 }
  0xff   : > { %p2956_p2 = pnand %p2954_p5, %p3378_p10  ;;  %p2962_p7 = scmp.lt.s32.totalorder %s2960_s19, %s2953_s3 }
 0x101   : > { %p2957_p12 = pneg %p2956_p2  ;;  %p2963_p0 = por %p2962_p7, %p2961_p9 }
 0x103   : > { %p2964_p4 = pnand %p2963_p0, %p2957_p12 }
 0x105   : > { %2967 = shalt.err (!%p2964_p4)
}
 0x106   : > { %p3946_p8 = scmp.ne.s32.totalorder %s3935_s17, 0  ;;  %s3133_s8 = smov [#allocation17]  }
 0x107   : > { %s572_s30 = sshll.u32 %s3133_s8, 4  ;;  %s3574_s0 = scalar_lea.hbm %s3876_s13, %s3353_s24  ;;  %s573_s30 = int_to_ptr.vmem [resolvable:$true] %s572_s30 }
 0x108   : > { %2573 = dma.hbm_to_vmem [thread:$0]  (!%p3946_p8), %s3549_s29, 16, %s734_s22, %s3372_s18  }
 0x109   : > { %s2968_s3 = scalar_lea.hbm %s3879_s16, 256  ;;  %p3947_p7 = scmp.ne.s32.totalorder %s3932_s26, 0 }
 0x10a   : > { %p2969_p0 = scmp.ne.s32.totalorder %s3879_s16, %s2968_s3  ;;  %p2975_p1 = scmp.lt.u32.totalorder %s2968_s3, %s3879_s16 }
 0x10c   : > { %p2971_p11 = pnand %p2969_p0, %p3947_p7 }
 0x10e   : > { %p2972_p3 = pneg %p2971_p11 }
 0x110   : > { %p2977_p13 = pnand %p2975_p1, %p2972_p3 }
 0x112   : > { %2980 = shalt.err (!%p2977_p13)
}
 0x113   : > { %s2981_s19 = scalar_lea.vmem %s573_s30, 256  ;;  %p2989_p12 = scmp.lt.s32.totalorder %s573_s30, %s573_s30 }
 0x114   : > { %p2982_p6 = scmp.ne.s32.totalorder %s573_s30, %s2981_s19  ;;  %p2990_p9 = scmp.lt.s32.totalorder %s2981_s19, %s2981_s19 }
 0x116   : > { %p2984_p5 = pnand %p2982_p6, %p3947_p7  ;;  %p2991_p4 = por %p2990_p9, %p2989_p12 }
 0x118   : > { %p2985_p2 = pneg %p2984_p5 }
 0x11a   : > { %p2992_p8 = pnand %p2991_p4, %p2985_p2 }
 0x11c   : > { %2995 = shalt.err (!%p2992_p8)
}
 0x11d   : > { %p3948_p0 = scmp.ne.s32.totalorder %s3930_s2, 0  ;;  %s3949_s24 = smov 4  }
 0x11e   : > { %s3950_s8 = smov 64   ;;  %s743_s26 = scalar_lea.vmem [#allocation16], %s3350_s21 }
 0x11f   : > { %2551 = dma.hbm_to_vmem [thread:$0]  (!%p3948_p0), %s3879_s16, 256, %s573_s30, [#allocation8], %s3950_s8, %s3950_s8, %s3949_s24  }
 0x120   : > { %s750_s10 = sshll.u32 %s743_s26, 4  ;;  %s2996_s28 = scalar_lea.hbm %s3574_s0, 16  ;;  %s751_s10 = int_to_ptr.vmem [resolvable:$true] %s750_s10 }
 0x121   : > { %p2997_p8 = scmp.ne.s32.totalorder %s3574_s0, %s2996_s28  ;;  %s3001_s14 = scalar_lea.hbm %s3876_s13, 32 }
 0x122   : > { %p3002_p3 = scmp.lt.u32.totalorder %s3574_s0, %s3876_s13  ;;  %p3003_p1 = scmp.lt.u32.totalorder %s3001_s14, %s2996_s28 }
 0x123   : > { %p2999_p7 = pnand %p2997_p8, %p3378_p10  ;;  %p3005_p6 = scmp.lt.u32.totalorder %s2996_s28, %s3574_s0 }
 0x124   : > { %p3004_p13 = por %p3003_p1, %p3002_p3 }
 0x125   : > { %p3000_p11 = pneg %p2999_p7 }
 0x126   : > { %p3006_p5 = por %p3005_p6, %p3004_p13 }
 0x128   : > { %p3007_p2 = pnand %p3006_p5, %p3000_p11 }
 0x12a   : > { %3010 = shalt.err (!%p3007_p2)
}
 0x12b   : > { %s3011_s21 = scalar_lea.vmem %s751_s10, 16  ;;  %s3134_s30 = smov [#allocation16]  }
 0x12c   : > { %p3012_p12 = scmp.ne.s32.totalorder %s751_s10, %s3011_s21  ;;  %s3016_s22 = sshll.u32 %s3134_s30, 4  ;;  %s3017_s22 = int_to_ptr.vmem [resolvable:$false] %s3016_s22 }
 0x12d   : > { %s3018_s19 = scalar_lea.vmem %s3017_s22, 32  ;;  %p3019_p0 = scmp.lt.s32.totalorder %s751_s10, %s3017_s22 }
 0x12e   : > { %p3014_p9 = pnand %p3012_p12, %p3378_p10  ;;  %p3020_p8 = scmp.lt.s32.totalorder %s3018_s19, %s3011_s21 }
 0x130   : > { %p3015_p4 = pneg %p3014_p9  ;;  %p3021_p7 = por %p3020_p8, %p3019_p0 }
 0x132   : > { %p3022_p1 = pnand %p3021_p7, %p3015_p4 }
 0x134   : > { %3025 = shalt.err (!%p3022_p1)
}
 0x135   : > { %p3951_p3 = scmp.ne.s32.totalorder %s3935_s17, 0  ;;  %p3952_p11 = scmp.ne.s32.totalorder %s3929_s25, 0 }
 0x136   : > { %p3953_p10 = scmp.eq.s32.totalorder (!%p3952_p11), %s3272_s1, 0 }
 0x137   : > { %2576 = dma.hbm_to_vmem [thread:$0]  (!%p3951_p3), %s3574_s0, 16, %s751_s10, %s3372_s18  }
 0x138   : > { %759 = sbr.rel (%p3952_p11) target bundleno = 3448 (0xd78), region = 92 }
 0x13f   : > { %3077 = dma.done.wait (%p3953_p10), [#allocation5], 128   ;;  %p3954_p13 = pmov %p3953_p10 }
 0x140   : > { %p3955_p6 = pmov %p3953_p10 }
 0x141   : > { %3079 = vsyncadd (%p3954_p13), [#allocation5], 4294967168 }
 0x142   : > { %3081 = dma.done.wait (%p3955_p6), [#allocation8], 32   ;;  %p3956_p5 = pmov %p3955_p6 }
 0x143   : > { %s3957_s17 = sld [smem:[#allocation24_spill]]  ;;  %s3958_s20 = sld [smem:[#allocation30_spill]] }
 0x144   : > { %3083 = vsyncadd (%p3956_p5), [#allocation8], 4294967264  ;;  %s769_s24 = sand.u32 1, %s3272_s1  }
 0x145   : > { %s770_s25 = scalar_lea.sflag [#allocation5], %s769_s24 }
 0x149   : > { %s3628_s18 = sand.u32 1, %s3957_s17   ;;  %p3959_p2 = scmp.ne.s32.totalorder %s3958_s20, 0 }
 0x14b   : > { %3085 = dma.done.wait (%p3959_p2), %s770_s25, 128  }
 0x14c   : > { %3087 = vsyncadd (%p3959_p2), %s770_s25, 4294967168  ;;  %p3960_p12 = pmov %p3956_p5 }
 0x14d   : > { %p3961_p9 = pmov %p3956_p5 }
 0x14e   : > { %3089 = dma.done.wait (%p3960_p12), [#allocation8], 256  }
 0x14f   : > { %3091 = vsyncadd (%p3961_p9), [#allocation8], 4294967040  ;;  %s3962_s3 = sld [smem:[#allocation26_spill]]  ;;  %s3963_s22 = sld [smem:[#allocation34_spill]] }
 0x150   : > { %s3964_s24 = sld [smem:[#allocation36_spill]]  ;;  %s3965_s10 = sld [smem:[#allocation37_spill]] }
 0x151   : > { %s3966_s8 = sld [smem:[#allocation38_spill]] }
 0x155   : > { %p929_p4 = scmp.lt.s32.totalorder %s3962_s3, 1  ;;  %p2317_p0 = scmp.ne.s32.totalorder %s3962_s3, 0 }
 0x156   : > { %v2371_v0 = vld [vmem:[#allocation4] sm:$0xff] (!%p2317_p0)   ;;  %vm957_vm0 = vcmask (!%p2317_p0), 261120  }
 0x157   : > { %s930_s14 = scalar_select %p929_p4, %s3962_s3, 1 }
 0x158   : > { %954 = sbr.rel (%p2317_p0) target bundleno = 351 (0x15f), region = 140  ;;  %v2372_v1 = vunpack.c.l.bf16 (!%p2317_p0), %v2371_v0  ;;  %v2373_v2 = vunpack.c.h.bf16 (!%p2317_p0), %v2371_v0 }
 0x159   : > { %s2366_s23 = sshll.u32 %s930_s14, 4  ;;  %s2369_s29 = sshll.u32 %s930_s14, 5 }
 0x15a   : > { %s933_s19 = scalar_lea.vmem %s3963_s22, %s2366_s23  ;;  %s3654_s25 = scalar_lea.vmem %s3964_s24, %s2366_s23  ;;  %958 = vst.msk [vmem:[#allocation2] sm:$0xff] (!%p2317_p0), %vm957_vm0, %v2372_v1  ;;  %962 = vst.msk [vmem:[#allocation2 + $0x8] sm:$0xff] (!%p2317_p0), %vm957_vm0, %v2373_v2 }
 0x15b   : > { %s3659_s26 = scalar_lea.vmem %s3965_s10, %s2366_s23  ;;  %s3664_s0 = scalar_lea.vmem %s3966_s8, %s2369_s29 }
 0x15f PF: > { %v2654_v3 = vld [vmem:[%s933_s19] sm:$0xff]   ;;  %v3135_v4 = vmov 0.0   ;;  %v2655_v5 = vld [vmem:[%s933_s19 + $0x8] sm:$0xff]   ;;  %vm3136_vm1 = vmmov 0   ;;  %vm989_vm2 = vcmask 261120   ;;  %s3967_s8 = scalar_lea.vmem [#allocation9], %s3628_s18  ;;  %v1039_v28 = vlaneseq }
 0x160   : > { %2410 = vmatprep.subr.bf16.mxu0 %v3135_v4  ;;  %2418 = vmatprep.subr.bf16.mxu1 %v3135_v4  ;;  %v2318_v9 = vld [vmem:[%s3967_s8] ss:$0 sm:$0xff]  ;;  %s3137_s27 = smov 112   ;;  %s3138_s4 = smov 96   ;;  %vm1047_vm3 = vcmask 130048   ;;  %vm1094_vm4 = vcmask 64512  }
 0x161   : > { %2411 = vmatpush3.bf16.msra.mxu0 %v2654_v3  ;;  %2414 = vmatprep.mubr.msk.bf16.mxu0 %vm3136_vm1, %v3135_v4  ;;  %v3671_v6 = vld [vmem:[#allocation2] sm:$0xff]  ;;  %v3673_v7 = vld [vmem:[#allocation2 + $0x8] sm:$0xff]  ;;  %s3139_s10 = smov 80   ;;  %v3719_v31 = vshrl.u32 %v1039_v28, 7  ;;  %s3140_s28 = smov 64   ;;  %vm1112_vm5 = vcmask 1043456  }
 0x162   : > { %2412 = vmatprep.subr.bf16.mxu0 %v3135_v4  ;;  %2420 = vmatprep.mubr.msk.bf16.mxu1 %vm3136_vm1, %v3135_v4  ;;  %v965_v8 = vpack.c.bf16 %v3673_v7, %v3671_v6  ;;  %v1035_v29 = vld [vmem:[#allocation7] sm:$0x1]  ;;  %v1273_v39 = vld [vmem:[#allocation7 + $0x1] sm:$0x1]  ;;  %s3141_s2 = smov 48   ;;  %s3142_s3 = smov 16  }
 0x163   : > { %v2322_v30 = vadd.f32 -1.0, %v1035_v29  ;;  %v1041_v33 = vsub.s32 0, %v3719_v31  ;;  %v2327_v42 = vadd.f32 -1.0, %v1273_v39  ;;  %s3968_s14 = scalar_lea.vmem [#allocation10], %s3628_s18  ;;  %s3969_s23 = scalar_lea.vmem [#allocation11], %s3628_s18  ;;  %vm1743_vm6 = vcmask 523264  }
 0x164   : > { %s3971_s29 = scalar_lea.vmem [#allocation13], %s3628_s18  ;;  %s3973_s21 = scalar_lea.vmem [#allocation15], %s3628_s18 }
 0x165   : > { %2413 = vmatpush3.bf16.msra.mxu0 %v2655_v5  ;;  %v1037_v32 = vmul.f32 1e+09, %v2322_v30  ;;  %v1275_v46 = vmul.f32 1e+09, %v2327_v42  ;;  %s3974_s30 = scalar_lea.vmem [#allocation16], %s3628_s18  ;;  %s3975_s22 = sld [smem:[#allocation26_spill]] }
 0x166   : > { %2424 = vmatprep.subr.bf16.mxu0 %v3135_v4 }
 0x167   : > { %v1042_v34 = vrot.slane %v1037_v32, %v1041_v33  ;;  %v1280_v50 = vrot.slane %v1275_v46, %v1041_v33 }
 0x168   : > { %2415 = vmatmul.mubr.msk.bf16.vlgmr.msra.gmra.mrb[0].mxu0 %vm989_vm2, %v965_v8 }
 0x169   : > { %2426 = vmatprep.mubr.msk.bf16.mxu0 %vm3136_vm1, %v3135_v4 }
 0x16b   : > { %p2350_p8 = scmp.ne.s32.totalorder %s3975_s22, 1 }
 0x16c   : > { %s3976_s20 = sld [smem:[#allocation39_spill]] (!%p2350_p8)  ;;  %vm3144_vm7 = vmmov (!%p2350_p8), 0   ;;  %vm1852_vm8 = vcmask (!%p2350_p8), 1040384  }
 0x23b   : > { %v1027_v10 = vpop.f32.mrb[0].mxu0 }
 0x23c   : > { %v2416_v11 = vpop.f32.mrb[1].mxu0  ;;  %v1028_v13 = vadd.f32 %v2318_v9, %v1027_v10 }
 0x23d   : > { %v1030_v12 = vpop.f32.mrb[2].mxu0 }
 0x23e   : > { %v1031_v14 = vadd.f32 %v2318_v9, %v1030_v12  ;;  %v2417_v15 = vpop.f32.mrb[3].mxu0 }
 0x240   : > { %v3686_v16 = vpack.c.bf16 %v1031_v14, %v1028_v13 }
 0x242   : > { %1156 = vrot.lane.b32.xlu1 %v3686_v16, %s3137_s27  ;;  %1045 = vrot.lane.b32.xlu0 %v3686_v16, %s3138_s4  ;;  %v3691_v17 = vrot.slane %v3686_v16, 4 }
 0x246   : > { %1158 = vrot.lane.b32.xlu0 %v3686_v16, %s3139_s10  ;;  %1283 = vrot.lane.b32.xlu1 %v3691_v17, %s3138_s4 }
 0x24a   : > { %1393 = vrot.lane.b32.xlu0 %v3691_v17, %s3139_s10  ;;  %1391 = vrot.lane.b32.xlu1 %v3691_v17, %s3137_s27  ;;  %s3977_s27 = sld [smem:[#allocation40_spill]] (!%p2350_p8) }
 0x2b4   : > { %v1046_v18 = vpop.permute.xlu0 %1045  ;;  %v1157_v21 = vpop.permute.xlu1 %1156 }
 0x2b5   : > { %v1052_v19 = vsel %vm1047_vm3, %v1046_v18, 0 }
 0x2b6   : > { %2419 = vmatpush3.bf16.xpose.msra.mxu1 %v1052_v19 }
 0x2b7   : > { %2430 = vmatprep.subr.bf16.mxu1 %v3135_v4 }
 0x2b8   : > { %v1159_v20 = vpop.permute.xlu0 %1158  ;;  %v1284_v23 = vpop.permute.xlu1 %1283 }
 0x2b9   : > { %v1164_v22 = vsel %vm1047_vm3, %v1159_v20, 0  ;;  %v1289_v24 = vsel %vm1047_vm3, %v1284_v23, 0 }
 0x2bc   : > { %v1394_v25 = vpop.permute.xlu0 %1393  ;;  %v1392_v27 = vpop.permute.xlu1 %1391 }
 0x2bd   : > { %2421 = vmatmul.mubr.msk.bf16.vlgmr.msra.gmra.mrb[0].mxu1 %vm1047_vm3, %v3686_v16  ;;  %v1399_v26 = vsel %vm1047_vm3, %v1394_v25, 0 }
 0x2be   : > { %2431 = vmatpush3.bf16.xpose.msra.mxu1 %v1164_v22  ;;  %2432 = vmatprep.mubr.msk.bf16.mxu1 %vm3136_vm1, %v3135_v4 }
 0x2bf   : > { %2442 = vmatprep.subr.bf16.mxu1 %v3135_v4 }
 0x2c5   : > { %2433 = vmatmul.mubr.msk.bf16.vlgmr.msra.gmra.mrb[4].mxu1 %vm1047_vm3, %v1157_v21 }
 0x2c6   : > { %2443 = vmatpush3.bf16.xpose.msra.mxu1 %v1289_v24  ;;  %2444 = vmatprep.mubr.msk.bf16.mxu1 %vm3136_vm1, %v3135_v4 }
 0x2c7   : > { %2454 = vmatprep.subr.bf16.mxu1 %v3135_v4 }
 0x2cd   : > { %2445 = vmatmul.mubr.msk.bf16.vlgmr.msra.gmra.mrb[8].mxu1 %vm1047_vm3, %v3691_v17 }
 0x2ce   : > { %2455 = vmatpush3.bf16.xpose.msra.mxu1 %v1399_v26  ;;  %2456 = vmatprep.mubr.msk.bf16.mxu1 %vm3136_vm1, %v3135_v4 }
 0x2cf   : > { %2466 = vmatprep.subr.bf16.mxu1 %v3135_v4 }
 0x2d5   : > { %2457 = vmatmul.mubr.msk.bf16.vlgmr.msra.gmra.mrb[12].mxu1 %vm1047_vm3, %v1392_v27 }
 0x2d6   : > { %2470 = vmatprep.mubr.msk.bf16.mxu1 %vm3136_vm1, %v3135_v4 }
 0x390   : > { %v1088_v35 = vpop.f32.mrb[0].mxu1 }
 0x391   : > { %v1089_v36 = vadd.f32 %v1088_v35, %v1042_v34  ;;  %v2422_v37 = vpop.f32.mrb[1].mxu1 }
 0x392   : > { %v1091_v38 = vpop.f32.mrb[2].mxu1 }
 0x393   : > { %v2423_v40 = vpop.f32.mrb[3].mxu1  ;;  %v1095_v41 = vsel %vm1094_vm4, %v1089_v36, -inf }
 0x394   : > { %1096 = vmax.xlane.f32.xlu0 %v1095_v41 }
 0x398   : > { %v1200_v43 = vpop.f32.mrb[4].mxu1 }
 0x399   : > { %v1201_v44 = vadd.f32 %v1200_v43, %v1042_v34  ;;  %v2434_v45 = vpop.f32.mrb[5].mxu1 }
 0x39a   : > { %v1203_v47 = vpop.f32.mrb[6].mxu1 }
 0x39b   : > { %v2435_v48 = vpop.f32.mrb[7].mxu1  ;;  %v1206_v49 = vsel %vm1094_vm4, %v1201_v44, -inf }
 0x39c   : > { %1207 = vmax.xlane.f32.xlu1 %v1206_v49 }
 0x3a0   : > { %v1325_v51 = vpop.f32.mrb[8].mxu1 }
 0x3a1   : > { %v1326_v52 = vadd.f32 %v1325_v51, %v1280_v50  ;;  %v2446_v53 = vpop.f32.mrb[9].mxu1 }
 0x3a2   : > { %v1328_v54 = vpop.f32.mrb[10].mxu1 }
 0x3a3   : > { %v2447_v55 = vpop.f32.mrb[11].mxu1  ;;  %v1331_v56 = vsel %vm1094_vm4, %v1326_v52, -inf }
 0x3a4   : > { %1332 = vmax.xlane.f32.xlu0 %v1331_v56  ;;  %v2656_v55 = vld [vmem:[%s3654_s25] sm:$0xff]   ;;  %v2657_v56 = vld [vmem:[%s3654_s25 + $0x8] sm:$0xff]  }
 0x3a5   : > { %2467 = vmatpush3.bf16.msra.mxu1 %v2656_v55 }
 0x3a6   : > { %2468 = vmatprep.subr.bf16.mxu1 %v3135_v4 }
 0x3a8   : > { %v1435_v57 = vpop.f32.mrb[12].mxu1 }
 0x3a9   : > { %v1436_v58 = vadd.f32 %v1435_v57, %v1280_v50  ;;  %v2458_v59 = vpop.f32.mrb[13].mxu1  ;;  %2469 = vmatpush3.bf16.msra.mxu1 %v2657_v56 }
 0x3aa   : > { %v1438_v60 = vpop.f32.mrb[14].mxu1  ;;  %2482 = vmatprep.subr.bf16.mxu1 %v3135_v4 }
 0x3ab   : > { %v2459_v61 = vpop.f32.mrb[15].mxu1  ;;  %v1441_v62 = vsel %vm1094_vm4, %v1436_v58, -inf }
 0x3ac   : > { %1442 = vmax.xlane.f32.xlu0 %v1441_v62 }
 0x421   : > { %v1097_v63 = vpop.xlane.xlu0 %1096 }
 0x422   : > { %v1098_v0 = vsub.f32 %v1089_v36, %v1097_v63 }
 0x424   : > { %v1099_v1 = vmul.f32 1.442695, %v1098_v0 }
 0x426   : > { %2664 = vpow2.f32 %v1099_v1 }
 0x429   : > { %v1208_v2 = vpop.xlane.xlu1 %1207 }
 0x42a   : > { %v1209_v3 = vsub.f32 %v1201_v44, %v1208_v2 }
 0x42c   : > { %v1210_v5 = vmul.f32 1.442695, %v1209_v3 }
 0x42e   : > { %2666 = vpow2.f32 %v1210_v5 }
 0x430   : > { %v2665_v8 = vpop.eup %2664 }
 0x431   : > { %v1101_v9 = vsel %vm1094_vm4, %v2665_v8, 0.0  ;;  %v1333_v10 = vpop.xlane.xlu0 %1332 }
 0x432   : > { %1102 = vadd.xlane.f32.xlu1 %v1101_v9  ;;  %v1334_v20 = vsub.f32 %v1326_v52, %v1333_v10 }
 0x434   : > { %v1335_v21 = vmul.f32 1.442695, %v1334_v20 }
 0x438   : > { %v2667_v11 = vpop.eup %2666 }
 0x439   : > { %v1443_v12 = vpop.xlane.xlu0 %1442  ;;  %v1212_v13 = vsel %vm1094_vm4, %v2667_v11, 0.0 }
 0x43a   : > { %v1444_v14 = vsub.f32 %v1436_v58, %v1443_v12  ;;  %1213 = vadd.xlane.f32.xlu0 %v1212_v13 }
 0x43c   : > { %v1445_v15 = vmul.f32 1.442695, %v1444_v14 }
 0x43e   : > { %2668 = vpow2.f32 %v1445_v15 }
 0x43f   : > { %2670 = vpow2.f32 %v1335_v21 }
 0x443   : > { %1107 = vrot.lane.b32.xlu1 %v3686_v16, %s3140_s28 }
 0x448   : > { %v2669_v18 = vpop.eup %2668 }
 0x449   : > { %v1447_v19 = vsel %vm1094_vm4, %v2669_v18, 0.0  ;;  %v2671_v22 = vpop.eup %2670 }
 0x44a   : > { %1448 = vadd.xlane.f32.xlu0 %v1447_v19  ;;  %v1337_v23 = vsel %vm1094_vm4, %v2671_v22, 0.0 }
 0x460   : > { %1218 = vrot.lane.b32.xlu0 %v3686_v16, %s3141_s2 }
 0x467   : > { %1338 = vadd.xlane.f32.xlu1 %v1337_v23 }
 0x478   : > { %1343 = vrot.lane.b32.xlu1 %v3691_v17, %s3140_s28  ;;  %s3978_s28 = sld [smem:[#allocation41_spill]] (!%p2350_p8) }
 0x47c   : > { %1453 = vrot.lane.b32.xlu1 %v3691_v17, %s3141_s2 }
 0x4bf   : > { %v1103_v24 = vpop.xlane.xlu1 %1102 }
 0x4c0   : > { %2672 = vrcp.f32 %v1103_v24 }
 0x4c3   : > { %v1108_v25 = vpop.permute.xlu1 %1107 }
 0x4c4   : > { %v1114_v26 = vsel %vm1112_vm5, %v1108_v25, 0 }
 0x4c5   : > { %2425 = vmatpush3.bf16.msra.mxu0 %v1114_v26 }
 0x4c6   : > { %2436 = vmatprep.subr.bf16.mxu0 %v3135_v4 }
 0x4c7   : > { %v1214_v28 = vpop.xlane.xlu0 %1213 }
 0x4c8   : > { %2674 = vrcp.f32 %v1214_v28 }
 0x4ca   : > { %v2673_v27 = vpop.eup %2672 }
 0x4cb   : > { %v1105_v16 = vmul.f32 %v2673_v27, %v2665_v8 }
 0x4cd   : > { %v1106_v29 = vpack.c.bf16 %v1105_v16, %v1105_v16 }
 0x4cf   : > { %2427 = vmatmul.mubr.msk.bf16.vlgmr.msra.gmra.mrb[4].mxu0 %vm1094_vm4, %v1106_v29 }
 0x4d0   : > { %2438 = vmatprep.mubr.msk.bf16.mxu0 %vm3136_vm1, %v3135_v4 }
 0x4d2   : > { %v2675_v17 = vpop.eup %2674 }
 0x4d3   : > { %v1216_v32 = vmul.f32 %v2675_v17, %v2667_v11  ;;  %v2332_v11 = vld [vmem:[%s3968_s14] ss:$0 sm:$0xff] }
 0x4d5   : > { %v1217_v35 = vpack.c.bf16 %v1216_v32, %v1216_v32  ;;  %v2659_v32 = vld [vmem:[%s3659_s26 + $0x8] sm:$0xff]  }
 0x4d7   : > { %v1449_v30 = vpop.xlane.xlu0 %1448 }
 0x4db   : > { %v1219_v33 = vpop.permute.xlu0 %1218 }
 0x4dc   : > { %v1224_v34 = vsel %vm1112_vm5, %v1219_v33, 0 }
 0x4dd   : > { %2437 = vmatpush3.bf16.msra.mxu0 %v1224_v34 }
 0x4de   : > { %2448 = vmatprep.subr.bf16.mxu0 %v3135_v4 }
 0x4e0   : > { %2439 = vmatmul.mubr.msk.bf16.vlgmr.msra.gmra.mrb[8].mxu0 %vm1094_vm4, %v1217_v35 }
 0x4e1   : > { %2450 = vmatprep.mubr.msk.bf16.mxu0 %vm3136_vm1, %v3135_v4 }
 0x4f4   : > { %v1339_v36 = vpop.xlane.xlu1 %1338 }
 0x4f5   : > { %2676 = vrcp.f32 %v1339_v36 }
 0x4f6   : > { %2678 = vrcp.f32 %v1449_v30 }
 0x4f8   : > { %v1344_v37 = vpop.permute.xlu1 %1343 }
 0x4f9   : > { %v1349_v38 = vsel %vm1112_vm5, %v1344_v37, 0 }
 0x4fa   : > { %2449 = vmatpush3.bf16.msra.mxu0 %v1349_v38 }
 0x4fb   : > { %2460 = vmatprep.subr.bf16.mxu0 %v3135_v4 }
 0x4fc   : > { %v1454_v41 = vpop.permute.xlu1 %1453 }
 0x4fd   : > { %v1459_v44 = vsel %vm1112_vm5, %v1454_v41, 0  ;;  %v2336_v41 = vld [vmem:[%s3969_s23] ss:$0 sm:$0xff] }
 0x4ff   : > { %v2677_v39 = vpop.eup %2676 }
 0x500   : > { %v1341_v40 = vmul.f32 %v2677_v39, %v2671_v22  ;;  %v2679_v43 = vpop.eup %2678 }
 0x501   : > { %v1451_v45 = vmul.f32 %v2679_v43, %v2669_v18 }
 0x502   : > { %v1342_v42 = vpack.c.bf16 %v1341_v40, %v1341_v40 }
 0x503   : > { %v1452_v46 = vpack.c.bf16 %v1451_v45, %v1451_v45 }
 0x504   : > { %2451 = vmatmul.mubr.msk.bf16.vlgmr.msra.gmra.mrb[12].mxu0 %vm1094_vm4, %v1342_v42 }
 0x505   : > { %2461 = vmatpush3.bf16.msra.mxu0 %v1459_v44  ;;  %2462 = vmatprep.mubr.msk.bf16.mxu0 %vm3136_vm1, %v3135_v4 }
 0x506   : > { %2474 = vmatprep.subr.bf16.mxu0 %v3135_v4 }
 0x50c   : > { %2463 = vmatmul.mubr.msk.bf16.vlgmr.msra.gmra.mrb[16].mxu0 %vm1094_vm4, %v1452_v46 }
 0x50d   : > { %2478 = vmatprep.mubr.msk.bf16.mxu0 %vm3136_vm1, %v3135_v4 }
 0x5a2   : > { %v1150_v47 = vpop.f32.mrb[4].mxu0 }
 0x5a3   : > { %v2428_v48 = vpop.f32.mrb[5].mxu0 }
 0x5a4   : > { %v1153_v49 = vpop.f32.mrb[6].mxu0 }
 0x5a5   : > { %v2429_v50 = vpop.f32.mrb[7].mxu0 }
 0x5a6   : > { %v2660_v50 = vld [vmem:[%s3664_s0] sm:$0xff]  }
 0x5b3   : > { %v1260_v51 = vpop.f32.mrb[8].mxu0 }
 0x5b4   : > { %1267 = vrot.lane.b32.xlu0 %v1260_v51, %s3142_s3  ;;  %v2440_v52 = vpop.f32.mrb[9].mxu0  ;;  %v2661_v51 = vld [vmem:[%s3664_s0 + $0x8] sm:$0xff]  }
 0x5b5   : > { %v1263_v53 = vpop.f32.mrb[10].mxu0  ;;  %v2662_v52 = vld [vmem:[%s3664_s0 + $0x10] sm:$0xff]  }
 0x5b6   : > { %v2441_v54 = vpop.f32.mrb[11].mxu0  ;;  %v2663_v53 = vld [vmem:[%s3664_s0 + $0x18] sm:$0xff]   ;;  %s3972_s0 = scalar_lea.vmem [#allocation14], %s3628_s18 }
 0x5b7   : > { %v2338_v54 = vld [vmem:[%s3971_s29] ss:$0 sm:$0xff] }
 0x5d7   : > { %v1385_v57 = vpop.f32.mrb[12].mxu0 }
 0x5d8   : > { %v2452_v58 = vpop.f32.mrb[13].mxu0 }
 0x5d9   : > { %v1388_v59 = vpop.f32.mrb[14].mxu0 }
 0x5da   : > { %v2453_v60 = vpop.f32.mrb[15].mxu0 }
 0x5df   : > { %v1495_v61 = vpop.f32.mrb[16].mxu0 }
 0x5e0   : > { %1502 = vrot.lane.b32.xlu1 %v1495_v61, %s3142_s3  ;;  %v2464_v62 = vpop.f32.mrb[17].mxu0 }
 0x5e1   : > { %v1498_v63 = vpop.f32.mrb[18].mxu0 }
 0x5e2   : > { %v2465_v0 = vpop.f32.mrb[19].mxu0 }
 0x626   : > { %v1268_v1 = vpop.permute.xlu0 %1267 }
 0x627   : > { %v1270_v2 = vsel %vm1047_vm3, %v1150_v47, %v1268_v1 }
 0x628   : > { %1271 = vst.msk [vmem:[#allocation3] sm:$0xff] %vm989_vm2, %v1270_v2 }
 0x62f   : > { %v1507_v8 = vld [vmem:[#allocation3] sm:$0xff] }
 0x652   : > { %v1503_v3 = vpop.permute.xlu1 %1502 }
 0x653   : > { %v1505_v5 = vsel %vm1047_vm3, %v1385_v57, %v1503_v3 }
 0x654   : > { %1506 = vst.msk [vmem:[#allocation3 + $0x8] sm:$0xff] %vm989_vm2, %v1505_v5 }
 0x65b   : > { %v1508_v9 = vld [vmem:[#allocation3 + $0x8] sm:$0xff] }
 0x65c   : > { %v1509_v10 = vpack.c.bf16 %v1508_v9, %v1507_v8 }
 0x65e   : > { %2471 = vmatmul.mubr.msk.bf16.vlgmr.msra.gmra.mrb[16].mxu1 %vm989_vm2, %v1509_v10 }
 0x65f   : > { %2490 = vmatprep.mubr.msk.bf16.mxu1 %vm3136_vm1, %v3135_v4  ;;  %2483 = vmatpush3.bf16.msra.mxu1 %v2660_v50 }
 0x660   : > { %2484 = vmatprep.subr.bf16.mxu1 %v3135_v4 }
 0x663   : > { %2485 = vmatpush3.bf16.msra.mxu1 %v2661_v51 }
 0x664   : > { %2486 = vmatprep.subr.bf16.mxu1 %v3135_v4 }
 0x667   : > { %2487 = vmatpush3.bf16.msra.mxu1 %v2662_v52 }
 0x668   : > { %2488 = vmatprep.subr.bf16.mxu1 %v3135_v4 }
 0x66b   : > { %2489 = vmatpush3.bf16.msra.mxu1 %v2663_v53 }
 0x731   : > { %v1570_v12 = vpop.f32.mrb[16].mxu1 }
 0x732   : > { %v1571_v13 = vadd.f32 %v2332_v11, %v1570_v12  ;;  %v2472_v14 = vpop.f32.mrb[17].mxu1 }
 0x733   : > { %v1573_v15 = vpop.f32.mrb[18].mxu1 }
 0x734   : > { %v1574_v18 = vadd.f32 %v2332_v11, %v1573_v15  ;;  %v2473_v19 = vpop.f32.mrb[19].mxu1  ;;  %v1577_v20 = vadd.f32 %v1571_v13, %v3671_v6 }
 0x736   : > { %v1581_v21 = vsel %vm989_vm2, %v1577_v20, 0.0  ;;  %v1578_v22 = vadd.f32 %v1574_v18, %v3673_v7  ;;  %v2658_v7 = vld [vmem:[%s3659_s26] sm:$0xff]   ;;  %s3970_s26 = scalar_lea.vmem [#allocation12], %s3628_s18 }
 0x737   : > { %1582 = vadd.xlane.f32.xlu0 %v1581_v21  ;;  %2475 = vmatpush3.bf16.msra.mxu0 %v2658_v7  ;;  %v2337_v45 = vld [vmem:[%s3970_s26] ss:$0 sm:$0xff] }
 0x738   : > { %v1584_v23 = vsel %vm989_vm2, %v1578_v22, 0.0  ;;  %2476 = vmatprep.subr.bf16.mxu0 %v3135_v4  ;;  %v2347_v21 = vld [vmem:[%s3972_s0] ss:$0 sm:$0xff] }
 0x739   : > { %1585 = vadd.xlane.f32.xlu1 %v1584_v23 }
 0x73b   : > { %2477 = vmatpush3.bf16.msra.mxu0 %v2659_v32 }
 0x7c4   : > { %v1583_v24 = vpop.xlane.xlu0 %1582 }
 0x7c5   : > { %v1588_v25 = vmul.f32 0.03125, %v1583_v24 }
 0x7c6   : > { %v1586_v26 = vpop.xlane.xlu1 %1585 }
 0x7c7   : > { %v1590_v27 = vsub.f32 %v1577_v20, %v1588_v25  ;;  %v1589_v28 = vmul.f32 0.03125, %v1586_v26 }
 0x7c9   : > { %v1591_v16 = vsub.f32 %v1578_v22, %v1589_v28  ;;  %v1592_v29 = vmul.f32 %v1590_v27, %v1590_v27 }
 0x7cb   : > { %v1594_v17 = vsel %vm989_vm2, %v1592_v29, 0.0  ;;  %v1593_v6 = vmul.f32 %v1591_v16, %v1591_v16 }
 0x7cc   : > { %1595 = vadd.xlane.f32.xlu0 %v1594_v17 }
 0x7cd   : > { %v1597_v30 = vsel %vm989_vm2, %v1593_v6, 0.0 }
 0x7d0   : > { %1598 = vadd.xlane.f32.xlu0 %v1597_v30 }
 0x859   : > { %v1596_v33 = vpop.xlane.xlu0 %1595 }
 0x85a   : > { %v1600_v34 = vmul.f32 0.03125, %v1596_v33 }
 0x85c   : > { %v1602_v35 = vadd.f32 1e-05, %v1600_v34 }
 0x85d   : > { %v1599_v36 = vpop.xlane.xlu0 %1598 }
 0x85e   : > { %2680 = vrsqrt.f32 %v1602_v35  ;;  %v1601_v37 = vmul.f32 0.03125, %v1599_v36 }
 0x860   : > { %v1603_v38 = vadd.f32 1e-05, %v1601_v37 }
 0x862   : > { %2682 = vrsqrt.f32 %v1603_v38 }
 0x868   : > { %v2681_v39 = vpop.eup %2680 }
 0x869   : > { %v1606_v40 = vmul.f32 %v2681_v39, %v1590_v27 }
 0x86b   : > { %v1614_v43 = vmul.f32 %v2336_v41, %v1606_v40 }
 0x86c   : > { %v2683_v42 = vpop.eup %2682 }
 0x86d   : > { %v1607_v44 = vmul.f32 %v2683_v42, %v1591_v16  ;;  %v1622_v47 = vadd.f32 %v2337_v45, %v1614_v43 }
 0x86f   : > { %v1615_v46 = vmul.f32 %v2336_v41, %v1607_v44 }
 0x871   : > { %v1623_v48 = vadd.f32 %v2337_v45, %v1615_v46  ;;  %v2348_v45 = vld [vmem:[%s3973_s21] ss:$0 sm:$0xff] }
 0x873   : > { %v1624_v49 = vpack.c.bf16 %v1623_v48, %v1622_v47 }
 0x875   : > { %2479 = vmatmul.mubr.msk.bf16.vlgmr.msra.gmra.mrb[20].mxu0 %vm989_vm2, %v1624_v49 }
 0x948   : > { %v1685_v55 = vpop.f32.mrb[20].mxu0 }
 0x949   : > { %v1686_v56 = vadd.f32 %v2338_v54, %v1685_v55  ;;  %v2480_v57 = vpop.f32.mrb[21].mxu0  ;;  %v3143_v55 = vmov (!%p2350_p8), 0.0  }
 0x94a   : > { %v1688_v58 = vpop.f32.mrb[22].mxu0  ;;  %2494 = vmatprep.subr.bf16.mxu0 (!%p2350_p8), %v3143_v55  ;;  %2502 = vmatprep.subr.bf16.mxu1 (!%p2350_p8), %v3143_v55 }
 0x94b   : > { %v1694_v59 = vmul.f32 0.044715, %v1686_v56  ;;  %v1689_v60 = vadd.f32 %v2338_v54, %v1688_v58  ;;  %v2481_v61 = vpop.f32.mrb[23].mxu0  ;;  %v1692_v12 = vmul.f32 0.5, %v1686_v56  ;;  %v2692_v54 = vld [vmem:[%s3976_s20] sm:$0xff] (!%p2350_p8)   ;;  %2498 = vmatprep.mubr.msk.bf16.mxu0 (!%p2350_p8), %vm3144_vm7, %v3143_v55 }
 0x94c   : > { %2495 = vmatpush3.bf16.msra.mxu0 (!%p2350_p8), %v2692_v54  ;;  %v2695_v61 = vld [vmem:[#allocation17 + $0x8] sm:$0xff] (!%p2350_p8)  }
 0x94d   : > { %v1696_v62 = vmul.f32 %v1694_v59, %v1686_v56  ;;  %v1695_v63 = vmul.f32 0.044715, %v1689_v60  ;;  %v1693_v13 = vmul.f32 0.5, %v1689_v60  ;;  %2496 = vmatprep.subr.bf16.mxu0 (!%p2350_p8), %v3143_v55 }
 0x94f   : > { %v1698_v0 = vmul.f32 %v1696_v62, %v1686_v56  ;;  %v1697_v1 = vmul.f32 %v1695_v63, %v1689_v60  ;;  %v2351_v62 = vld [vmem:[%s3977_s27] ss:$0 sm:$0xff] (!%p2350_p8) }
 0x951   : > { %v1700_v2 = vadd.f32 %v1698_v0, %v1686_v56  ;;  %v1699_v3 = vmul.f32 %v1697_v1, %v1689_v60  ;;  %v2693_v56 = vld [vmem:[%s3976_s20 + $0x8] sm:$0xff] (!%p2350_p8)  }
 0x952   : > { %2497 = vmatpush3.bf16.msra.mxu0 (!%p2350_p8), %v2693_v56 }
 0x953   : > { %v1702_v5 = vmul.f32 0.7978846, %v1700_v2  ;;  %v1701_v8 = vadd.f32 %v1699_v3, %v1689_v60  ;;  %v2694_v60 = vld [vmem:[#allocation17] sm:$0xff] (!%p2350_p8)  }
 0x955   : > { %2684 = vtanh.f32 %v1702_v5  ;;  %v1703_v4 = vmul.f32 0.7978846, %v1701_v8 }
 0x957   : > { %2686 = vtanh.f32 %v1703_v4  ;;  %v2355_v4 = vld [vmem:[%s3978_s28] ss:$0 sm:$0xff] (!%p2350_p8) }
 0x95f   : > { %v2685_v9 = vpop.eup %2684 }
 0x960   : > { %v1706_v10 = vadd.f32 1.0, %v2685_v9 }
 0x961   : > { %v2687_v11 = vpop.eup %2686 }
 0x962   : > { %v1707_v14 = vadd.f32 1.0, %v2687_v11  ;;  %v1708_v15 = vmul.f32 %v1706_v10, %v1692_v12 }
 0x964   : > { %v1709_v18 = vmul.f32 %v1707_v14, %v1693_v13 }
 0x966   : > { %v1710_v19 = vpack.c.bf16 %v1709_v18, %v1708_v15 }
 0x968   : > { %2491 = vmatmul.mubr.msk.bf16.vlgmr.msra.gmra.mrb[20].mxu1 %vm1743_vm6, %v1710_v19  ;;  %v3145_v19 = vmov (!%p2350_p8), 1966171168  }
 0x969   : > { %2506 = vmatprep.mubr.msk.bf16.mxu1 (!%p2350_p8), %vm3144_vm7, %v3143_v55  ;;  %2503 = vmatpush3.bf16.msra.mxu1 (!%p2350_p8), %v2694_v60 }
 0x96a   : > { %2504 = vmatprep.subr.bf16.mxu1 (!%p2350_p8), %v3143_v55 }
 0x96d   : > { %2505 = vmatpush3.bf16.msra.mxu1 (!%p2350_p8), %v2695_v61 }
 0xa3b   : > { %v1781_v20 = vpop.f32.mrb[20].mxu1 }
 0xa3c   : > { %v1788_v22 = vadd.f32 %v1781_v20, %v1622_v47  ;;  %v2492_v23 = vpop.f32.mrb[21].mxu1  ;;  %v1997_v20 = vunpack.c.l.s4 (!%p2350_p8), %v3145_v19 }
 0xa3d   : > { %v1784_v24 = vpop.f32.mrb[22].mxu1 }
 0xa3e   : > { %v1789_v25 = vadd.f32 %v1784_v24, %v1623_v48  ;;  %v2493_v26 = vpop.f32.mrb[23].mxu1  ;;  %v1797_v27 = vadd.f32 %v2347_v21, %v1788_v22  ;;  %v2349_v48 = vld [vmem:[%s3974_s30] ss:$0 sm:$0xff] }
 0xa40   : > { %v1801_v28 = vsel %vm989_vm2, %v1797_v27, 0.0  ;;  %v1798_v16 = vadd.f32 %v2347_v21, %v1789_v25  ;;  %v1998_v21 = vunpack.c.0.s8 (!%p2350_p8), %v1997_v20 }
 0xa41   : > { %1802 = vadd.xlane.f32.xlu1 %v1801_v28 }
 0xa42   : > { %v1804_v29 = vsel %vm989_vm2, %v1798_v16, 0.0  ;;  %v2001_v22 = vsub.s32 (!%p2350_p8), %v1998_v21, %v3719_v31 }
 0xa43   : > { %1805 = vadd.xlane.f32.xlu0 %v1804_v29 }
 0xace   : > { %v1803_v17 = vpop.xlane.xlu1 %1802 }
 0xacf   : > { %v1807_v6 = vmul.f32 0.03125, %v1803_v17 }
 0xad0   : > { %v1806_v30 = vpop.xlane.xlu0 %1805 }
 0xad1   : > { %v1809_v7 = vsub.f32 %v1797_v27, %v1807_v6  ;;  %v1808_v32 = vmul.f32 0.03125, %v1806_v30 }
 0xad3   : > { %v1810_v33 = vsub.f32 %v1798_v16, %v1808_v32  ;;  %v1811_v34 = vmul.f32 %v1809_v7, %v1809_v7 }
 0xad5   : > { %v1813_v35 = vsel %vm989_vm2, %v1811_v34, 0.0  ;;  %v1812_v36 = vmul.f32 %v1810_v33, %v1810_v33 }
 0xad6   : > { %1814 = vadd.xlane.f32.xlu1 %v1813_v35 }
 0xad7   : > { %v1816_v37 = vsel %vm989_vm2, %v1812_v36, 0.0 }
 0xad8   : > { %1817 = vadd.xlane.f32.xlu0 %v1816_v37 }
 0xb63   : > { %v1815_v38 = vpop.xlane.xlu1 %1814 }
 0xb64   : > { %v1819_v39 = vmul.f32 0.03125, %v1815_v38 }
 0xb65   : > { %v1818_v40 = vpop.xlane.xlu0 %1817 }
 0xb66   : > { %v1821_v41 = vadd.f32 1e-05, %v1819_v39  ;;  %v1820_v42 = vmul.f32 0.03125, %v1818_v40 }
 0xb68   : > { %2688 = vrsqrt.f32 %v1821_v41  ;;  %v1822_v43 = vadd.f32 1e-05, %v1820_v42 }
 0xb6a   : > { %2690 = vrsqrt.f32 %v1822_v43 }
 0xb72   : > { %v2689_v44 = vpop.eup %2688 }
 0xb73   : > { %v1825_v46 = vmul.f32 %v2689_v44, %v1809_v7 }
 0xb74   : > { %v2691_v47 = vpop.eup %2690 }
 0xb75   : > { %v1833_v49 = vmul.f32 %v2348_v45, %v1825_v46  ;;  %v1826_v50 = vmul.f32 %v2691_v47, %v1810_v33  ;;  %1848 = sbr.rel (%p2350_p8) target bundleno = 3416 (0xd58), region = 144 }
 0xb77   : > { %v1841_v51 = vadd.f32 %v2349_v48, %v1833_v49  ;;  %v1834_v52 = vmul.f32 %v2348_v45, %v1826_v50 }
 0xb79   : > { %1843 = vst.msk [vmem:[#allocation2] sm:$0xff] %vm989_vm2, %v1841_v51  ;;  %v1842_v53 = vadd.f32 %v2349_v48, %v1834_v52 }
 0xb7b   : > { %1844 = vst.msk [vmem:[#allocation2 + $0x8] sm:$0xff] %vm989_vm2, %v1842_v53  ;;  %v1850_v57 = vrot.slane (!%p2350_p8), %v1842_v53, 7 }
 0xb7d   : > { %v1853_v58 = vsel %vm1852_vm8, %v1841_v51, %v1850_v57 }
 0xb7e   : > { %v1854_v59 = vpack.c.bf16 %v1853_v58, %v1853_v58 }
 0xb80   : > { %2499 = vmatmul.mubr.msk.bf16.vlgmr.msra.gmra.mrb[0].mxu0 %vm989_vm2, %v1854_v59 }
 0xc53   : > { %v1915_v63 = vpop.f32.mrb[0].mxu0 }
 0xc54   : > { %v1916_v0 = vadd.f32 %v2351_v62, %v1915_v63  ;;  %v2500_v1 = vpop.f32.mrb[1].mxu0 }
 0xc55   : > { %v1918_v2 = vpop.f32.mrb[2].mxu0 }
 0xc56   : > { %2696 = vtanh.f32 %v1916_v0  ;;  %v2501_v3 = vpop.f32.mrb[3].mxu0 }
 0xc60   : > { %v2697_v5 = vpop.eup %2696 }
 0xc61   : > { %v1922_v8 = vpack.c.bf16 %v2697_v5, %v2697_v5 }
 0xc63   : > { %2507 = vmatmul.mubr.msk.bf16.vlgmr.msra.gmra.mrb[0].mxu1 %vm989_vm2, %v1922_v8 }
 0xd36   : > { %v1983_v9 = vpop.f32.mrb[0].mxu1 }
 0xd37   : > { %v1984_v10 = vadd.f32 %v2355_v4, %v1983_v9  ;;  %v2508_v11 = vpop.f32.mrb[1].mxu1 }
 0xd38   : > { %v1986_v12 = vpop.f32.mrb[2].mxu1 }
 0xd39   : > { %v2359_v13 = vmul.f32 -1.442695, %v1984_v10  ;;  %v2509_v14 = vpop.f32.mrb[3].mxu1 }
 0xd3b   : > { %2698 = vpow2.f32 %v2359_v13 }
 0xd45   : > { %v2699_v15 = vpop.eup %2698 }
 0xd46   : > { %v1992_v18 = vadd.f32 1.0, %v2699_v15 }
 0xd48   : > { %2700 = vrcp.f32 %v1992_v18 }
 0xd52   : > { %v2701_v23 = vpop.eup %2700 }
 0xd53   : > { %v2002_v24 = vrot.slane %v2701_v23, %v2001_v22 }
 0xd55   : > { %v2003_v25 = vcombine.high %v2002_v24, %v2002_v24  ;;  %2360 = vst.sshfl [vmem:[#allocation18] sm:$0x1 pattern:$0x73625140] %v2002_v24 }
 0xd57   : > { %2361 = vst.sshfl [vmem:[#allocation18 + $0x1] sm:$0x1 pattern:$0x73625140] %v2003_v25 }
 0xd58 PF: > { %p2584_p7 = scmp.eq.s32.totalorder %s3272_s1, 1  ;;  %s3146_s2 = smov [#allocation18]  }
 0xd59   : > { %s2031_s14 = sshll.u32 %s3146_s2, 4  ;;  %s2032_s14 = int_to_ptr.vmem [resolvable:$true] %s2031_s14 }
 0xd5a   : > { %s3026_s23 = scalar_lea.vmem %s2032_s14, 32  ;;  %p3033_p10 = scmp.lt.s32.totalorder %s2032_s14, %s2032_s14 }
 0xd5b   : > { %p3027_p1 = scmp.ne.s32.totalorder %s2032_s14, %s3026_s23  ;;  %p3034_p13 = scmp.lt.s32.totalorder %s3026_s23, %s3026_s23 }
 0xd5d   : > { %p3028_p3 = pnand %p3027_p1, %p2584_p7  ;;  %p3035_p6 = por %p3034_p13, %p3033_p10 }
 0xd5f   : > { %p3029_p11 = pneg %p3028_p3 }
 0xd61   : > { %p3036_p5 = pnand %p3035_p6, %p3029_p11 }
 0xd63   : > { %3039 = shalt.err (!%p3036_p5)
}
 0xd64   : > { %s3979_s0 = sld [smem:[#allocation42_spill]] }
 0xd6a   : > { %s3980_s21 = smov %s3979_s0  ;;  %s3040_s30 = scalar_lea.hbm %s3979_s0, 32 }
 0xd6b   : > { %p3041_p2 = scmp.ne.s32.totalorder %s3980_s21, %s3040_s30  ;;  %p3046_p4 = scmp.lt.u32.totalorder %s3040_s30, %s3980_s21 }
 0xd6d   : > { %p3042_p12 = pnand %p3041_p2, %p2584_p7 }
 0xd6f   : > { %p3043_p9 = pneg %p3042_p12 }
 0xd71   : > { %p3048_p0 = pnand %p3046_p4, %p3043_p9 }
 0xd73   : > { %3051 = shalt.err (!%p3048_p0)
}
 0xd74   : > { %s3147_s24 = smov 1  }
 0xd75   : > { %2539 = dma.vmem_to_hbm [thread:$0]  (%p2584_p7), %s2032_s14, 32, %s3980_s21, [#allocation6], %s3142_s3, %s3142_s3, %s3147_s24  }
 0xd76   : > { %3093 = dma.done.wait (%p2584_p7), [#allocation6], 32  }
 0xd77   : > { %3095 = vsyncadd (%p2584_p7), [#allocation6], 4294967264 }
 0xd78 PF: > { %s3981_s27 = sld [smem:[#allocation28_spill]]  ;;  %s3983_s28 = sld [smem:[#allocation25_spill]] }
 0xd79   : > { %s3984_s29 = sld [smem:[#allocation31_spill]]  ;;  %s3985_s30 = sld [smem:[#allocation27_spill]] }
 0xd7a   : > { %s3986_s0 = sld [smem:[#allocation29_spill]] }
 0xd7e   : > { %s31_s19 = sadd.s32 1, %s3981_s27   ;;  %s3982_s27 = sld [smem:[#allocation24_spill]] }
 0xd7f   : > { %p28_p8 = scmp.ge.s32.totalorder %s31_s19, 4  }
 0xd81   :  { %30 = sbr.rel (!%p28_p8) target bundleno = 17 (0x11), region = 242 }
 0xd88   :  { %2047 = vsyncpa [#allocation5], 1 }
 0xd89   :  { %2049 = vsyncpa [#allocation5 + $0x1], 1 }
 0xd8a   :  { %2050 = vsyncpa [#allocation8], 1 }
 0xd8b   :  { %2051 = vsyncpa [#allocation6], 1 }
 0xd8c   :  { %2053 = vsyncpa [#allocation6 + $0x1], 1 }

</bundles_post_ra>
